<compile_context>
chip_gen: v6e
topology: v6e:2x2x1
jax: 0.10.0
libtpu: 0.0.40
codegen_flags: <defaults>
</compile_context>

<pallas_src>
import math

import jax
import jax.numpy as jnp
from jax import lax
from jax.experimental import pallas as pl
from jax.experimental.pallas import tpu as pltpu


# ---------------------------------------------------------------------------
# Fused forward kernel (gridless; everything VMEM resident)
# ---------------------------------------------------------------------------

def _fused_forward_kernel(ids_tok_ref, ids_typ_ref, tgt_ref, lens_ref,
                          tok_emb_ref, type_emb_ref, enc_w_ref, enc_b_ref,
                          dec_emb_ref, w_out_ref, b_out_ref,
                          dec_out_ref, attn_ref):
    """Whole forward pass in one kernel.

    Layouts:
      ids_tok / ids_typ : (E, B*S, 1) int32   (row = b*S + s)
      tgt               : (B*T, 1)    int32   (row = b*T + t)
      lens              : (E, B, 1)   f32
      dec_out           : (T, B, H)   f32     (final seq-first layout)
      attn              : (E, T, B, S) f32    (final seq-first layout)
    """
    f32 = jnp.float32
    E, BS, _ = ids_tok_ref.shape
    _, B, _ = lens_ref.shape
    S = BS // B
    BT = tgt_ref.shape[0]
    T = BT // B
    Vtok = tok_emb_ref.shape[1]
    Vtyp = type_emb_ref.shape[1]
    Vtgt, H = dec_emb_ref.shape

    neg_big = f32(-1e30)
    inv_sqrt_h = f32(1.0 / math.sqrt(H))
    inv_e = f32(1.0 / E)

    # Hoisted iotas (JAX does not CSE broadcast_in_dim; build each once).
    tok_iota = lax.broadcasted_iota(jnp.int32, (BS, Vtok), 1)
    typ_iota = lax.broadcasted_iota(jnp.int32, (BS, Vtyp), 1)
    tgt_iota = lax.broadcasted_iota(jnp.int32, (BT, Vtgt), 1)
    # Block-diagonal position matrix for the masked-mean state matmul.
    col_bs = lax.broadcasted_iota(jnp.int32, (B, BS), 1)
    row_bs = lax.broadcasted_iota(jnp.int32, (B, BS), 0)
    pos_bs = (col_bs - row_bs * S).astype(f32)                 # (B, B*S)
    in_block = (pos_bs >= 0) & (pos_bs < S)
    # Column-position iota for the per-batch attention length mask.
    col_ts = lax.broadcasted_iota(jnp.int32, (T, S), 1).astype(f32)

    # ---------------- encoders (all batches jointly, rows b-major) ----------------
    banks = []          # per-encoder memory bank, (B*S, H)
    lens_eff = []       # per-encoder max(len, 1), (B, 1)
    states_sum = None   # sum over encoders of enc_state, (B, H)
    for e in range(E):
        # Embedding lookup as one-hot matmuls (no gathers, runs on the MXU).
        oh_tok = (ids_tok_ref[e] == tok_iota).astype(f32)       # (BS, Vtok)
        oh_typ = (ids_typ_ref[e] == typ_iota).astype(f32)       # (BS, Vtyp)
        emb = (jnp.dot(oh_tok, tok_emb_ref[e], preferred_element_type=f32)
               + jnp.dot(oh_typ, type_emb_ref[e], preferred_element_type=f32))
        h = jnp.tanh(jnp.dot(emb, enc_w_ref[e], preferred_element_type=f32)
                     + enc_b_ref[e])                             # (BS, H)
        banks.append(h)

        lens_e = lens_ref[e]                                     # (B, 1) f32
        lens_eff.append(jnp.maximum(lens_e, f32(1.0)))
        # enc_state = length-masked mean over the sequence, as ONE MXU matmul
        # (replaces the per-batch reduce/select loop).
        valid = in_block & (pos_bs < lens_e)                     # (B, B*S)
        m_mat = valid.astype(f32) / jnp.maximum(lens_e, f32(1.0))
        state_e = jnp.dot(m_mat, h, preferred_element_type=f32)  # (B, H)
        states_sum = state_e if states_sum is None else states_sum + state_e

    inits = states_sum * inv_e                                   # (B, H) decoder init

    # ---------------- decoder query embedding (all batches, rows b-major) ---------
    oh_q = (tgt_ref[...] == tgt_iota).astype(f32)                # (BT, Vtgt)
    q_all = jnp.dot(oh_q, dec_emb_ref[...], preferred_element_type=f32)   # (BT, H)

    # ---------------- per-batch attention + output projection ---------------------
    # (T, S) score tile per (batch, encoder); no B^2 block-diagonal masking.
    b_out = b_out_ref[...]                                       # (1, H)
    dec_cols = []
    attn_cols = [[None] * B for _ in range(E)]
    for b in range(B):
        q_b = q_all[b * T:(b + 1) * T, :] + inits[b:b + 1, :]    # (T, H)
        q_s = q_b * inv_sqrt_h                                   # fold 1/sqrt(H) once
        # Split-W_out projection: accumulate contributions, no concat needed.
        acc = jnp.dot(q_b, w_out_ref[0:H, :], preferred_element_type=f32)
        for e in range(E):
            bank_b = banks[e][b * S:(b + 1) * S, :]              # (S, H) static slice
            len_b = lens_eff[e][b:b + 1, :]                      # (1, 1), >= 1 ⇒ row never fully masked
            valid = col_ts < len_b                               # (T, S)
            # q @ bank^T via dot_general (contraction on dim 1 of both operands).
            scores = lax.dot_general(q_s, bank_b, (((1,), (1,)), ((), ())),
                                     preferred_element_type=f32)  # (T, S)
            masked = jnp.where(valid, scores, neg_big)
            mmax = jnp.max(masked, axis=-1, keepdims=True)
            p = jnp.exp(masked - mmax)
            a = p * pl.reciprocal(jnp.sum(p, axis=-1, keepdims=True), approx=False)
            attn_cols[e][b] = a                                  # (T, S)
            ctx = jnp.dot(a, bank_b, preferred_element_type=f32)  # (T, H)
            acc = acc + jnp.dot(ctx, w_out_ref[(e + 1) * H:(e + 2) * H, :],
                                preferred_element_type=f32)
        dec_cols.append(jnp.tanh(acc + b_out))                   # (T, H)

    # ---------------- single full-slab stores in final (seq-first) layout ---------
    dec_out_ref[...] = jnp.stack(dec_cols, axis=1).astype(dec_out_ref.dtype)      # (T, B, H)
    attn_full = jnp.stack([jnp.stack(attn_cols[e], axis=1) for e in range(E)],
                          axis=0)                                                  # (E, T, B, S)
    attn_ref[...] = attn_full.astype(attn_ref.dtype)


# ---------------------------------------------------------------------------
# Jitted wrapper around the single pallas_call
# ---------------------------------------------------------------------------

def _fused_forward(params, src_tok_list, src_typ_list, lens_list, tgt):
    """src/typ: tuples of (S, B) int32; lens: tuple of (B,) int32;
       tgt: (T_full, B, 1) int32.  Returns (dec_out [T,B,H], attn [E,T,B,S])."""
    src_tok = jnp.stack(src_tok_list).astype(jnp.int32)          # (E, S, B)
    src_typ = jnp.stack(src_typ_list).astype(jnp.int32)
    lens = jnp.stack(lens_list).astype(jnp.float32)[:, :, None]  # (E, B, 1)
    tgt = tgt[:-1]
    E, S, B = src_tok.shape
    T = tgt.shape[0]
    H = params["enc_b"].shape[-1]

    # b-major flattening of the tiny int id tensors (one small fused XLA op;
    # float outputs need NO boundary transposes — kernel writes final layout).
    ids_tok = jnp.transpose(src_tok, (0, 2, 1)).reshape(E, B * S, 1)
    ids_typ = jnp.transpose(src_typ, (0, 2, 1)).reshape(E, B * S, 1)
    tgt_ids = jnp.transpose(tgt[:, :, 0], (1, 0)).reshape(B * T, 1).astype(jnp.int32)

    vmem = pl.BlockSpec(memory_space=pltpu.MemorySpace.VMEM)

    dec_out, attn = pl.pallas_call(
        _fused_forward_kernel,
        out_shape=(
            jax.ShapeDtypeStruct((T, B, H), jnp.float32),
            jax.ShapeDtypeStruct((E, T, B, S), jnp.float32),
        ),
        in_specs=[vmem] * 11,
        out_specs=(vmem, vmem),
    )(ids_tok, ids_typ, tgt_ids, lens,
      params["tok_emb"], params["type_emb"], params["enc_W"], params["enc_b"],
      params["dec_emb"], params["W_out"], params["b_out"])

    # Already in final layout: dec_out [T, B, H], attn [E, T, B, S].
    return dec_out, attn


_fused_forward_jit = jax.jit(_fused_forward)


# ---------------------------------------------------------------------------
# Model
# ---------------------------------------------------------------------------

class MultiSourceAPTypeAppendedModelPallas:
    """JAX/Pallas port of MultiSourceAPTypeAppendedModel.forward."""

    def __init__(self, enc_rnn_size=32, num_pas=1, tok_vocab=50, type_vocab=6,
                 tgt_vocab=50, seed=42):
        self.enc_rnn_size = enc_rnn_size
        self.num_pas = num_pas
        self.src_types = ["l"] + [f"prevassign{i}" for i in range(num_pas)]
        self.ap_tool_dict = {}
        E = len(self.src_types)
        H = enc_rnn_size

        key = jax.random.PRNGKey(seed)
        ks = iter(jax.random.split(key, 7))
        # Per-encoder parameters are pre-stacked on a leading E axis so the
        # whole forward is a single pallas_call.
        self.params = {
            "dec_emb": 0.1 * jax.random.normal(next(ks), (tgt_vocab, H), jnp.float32),
            "W_out":   0.1 * jax.random.normal(next(ks), ((E + 1) * H, H), jnp.float32),
            "b_out":   0.1 * jax.random.normal(next(ks), (1, H), jnp.float32),
            "tok_emb": 0.1 * jax.random.normal(next(ks), (E, tok_vocab, H), jnp.float32),
            "type_emb": 0.1 * jax.random.normal(next(ks), (E, type_vocab, H), jnp.float32),
            "enc_W":   0.1 * jax.random.normal(next(ks), (E, H, H), jnp.float32),
            "enc_b":   0.1 * jax.random.normal(next(ks), (E, 1, H), jnp.float32),
        }

    def forward(self, src_list, tgt, lengths_list, bptt=False):
        src_toks, src_typs, lens = [], [], []
        for enc_type in self.src_types:
            if enc_type == "l":
                typ_key = "type"
            else:
                pa_indx = enc_type.split("prevassign")[-1]
                typ_key = f"patype{pa_indx}"
            src_toks.append(src_list[enc_type])
            src_typs.append(src_list[typ_key])
            lens.append(lengths_list[enc_type])

        shape0 = src_toks[0].shape
        for x in src_toks + src_typs:
            assert x.shape == shape0, "fused kernel expects all sources to share (S, B)"
        # TODO(synk): decoder.init_state caching (bptt=True path) is stateless here.
        # TODO(synk): heterogeneous per-source seq lengths would need padding to a common S.

        dec_out, attn = _fused_forward_jit(self.params, tuple(src_toks),
                                           tuple(src_typs), tuple(lens), tgt)
        attns = {f"std_{t}": attn[e] for e, t in enumerate(self.src_types)}
        return dec_out, attns


# ---------------------------------------------------------------------------
# Driver
# ---------------------------------------------------------------------------

if __name__ == "__main__":
    B, S, T, H = 2, 8, 8, 32
    tok_vocab, type_vocab, tgt_vocab = 50, 6, 50

    model = MultiSourceAPTypeAppendedModelPallas(
        enc_rnn_size=H, num_pas=1, tok_vocab=tok_vocab,
        type_vocab=type_vocab, tgt_vocab=tgt_vocab, seed=42)

    key = jax.random.PRNGKey(0)
    k = jax.random.split(key, 6)
    src_list = {
        "l":           jax.random.randint(k[0], (S, B), 0, tok_vocab, jnp.int32),
        "type":        jax.random.randint(k[1], (S, B), 0, type_vocab, jnp.int32),
        "prevassign0": jax.random.randint(k[2], (S, B), 0, tok_vocab, jnp.int32),
        "patype0":     jax.random.randint(k[3], (S, B), 0, type_vocab, jnp.int32),
    }
    tgt = jax.random.randint(k[4], (T, B, 1), 0, tgt_vocab, jnp.int32)
    lengths_list = {
        "l":           jnp.array([8, 5], dtype=jnp.int32),
        "prevassign0": jnp.array([6, 8], dtype=jnp.int32),
    }

    dec_out, attns = model.forward(src_list, tgt, lengths_list, bptt=False)
    dec_out = jax.block_until_ready(dec_out)
    for v in attns.values():
        jax.block_until_ready(v)

    assert dec_out.shape == (T - 1, B, H)
    assert attns["std_l"].shape == (T - 1, B, S)
    assert attns["std_prevassign0"].shape == (T - 1, B, S)
    assert bool(jnp.all(jnp.isfinite(dec_out)))
    assert bool(jnp.all(jnp.isfinite(attns["std_l"])))
    assert bool(jnp.all(jnp.isfinite(attns["std_prevassign0"])))
    # Attention rows must sum to 1 (exact-reciprocal softmax).
    row_sums = jnp.sum(attns["std_l"], axis=-1)
    assert bool(jnp.all(jnp.abs(row_sums - 1.0) < 1e-4))
    print("KERNEL_OK")
</pallas_src>

<mosaic_0001>
module attributes {stable_mosaic.version = 11 : i64} {
  func.func @_fused_forward_kernel(%arg0: memref<2x16x1xi32, #tpu.memory_space<vmem>>, %arg1: memref<2x16x1xi32, #tpu.memory_space<vmem>>, %arg2: memref<14x1xi32, #tpu.memory_space<vmem>>, %arg3: memref<2x2x1xf32, #tpu.memory_space<vmem>>, %arg4: memref<2x50x32xf32, #tpu.memory_space<vmem>>, %arg5: memref<2x6x32xf32, #tpu.memory_space<vmem>>, %arg6: memref<2x32x32xf32, #tpu.memory_space<vmem>>, %arg7: memref<2x1x32xf32, #tpu.memory_space<vmem>>, %arg8: memref<50x32xf32, #tpu.memory_space<vmem>>, %arg9: memref<96x32xf32, #tpu.memory_space<vmem>>, %arg10: memref<1x32xf32, #tpu.memory_space<vmem>>, %arg11: memref<7x2x32xf32, #tpu.memory_space<vmem>>, %arg12: memref<2x7x2x8xf32, #tpu.memory_space<vmem>>) attributes {dimension_semantics = [], scalar_prefetch = 0 : i64, scratch_operands = 0 : i64, tpu.core_type = #tpu.core_type<tc>} {
    %0 = tpu.iota {dimensions = array<i32: 1>} : vector<16x50xi32>
    %1 = tpu.iota {dimensions = array<i32: 1>} : vector<16x6xi32>
    %2 = tpu.iota {dimensions = array<i32: 1>} : vector<14x50xi32>
    %3 = tpu.iota {dimensions = array<i32: 1>} : vector<2x16xi32>
    %4 = tpu.iota {dimensions = array<i32: 0>} : vector<2x16xi32>
    %c8_i32 = arith.constant 8 : i32
    %5 = vector.broadcast %c8_i32 : i32 to vector<2x16xi32>
    %6 = arith.muli %4, %5 : vector<2x16xi32>
    %7 = arith.subi %3, %6 : vector<2x16xi32>
    %8 = arith.sitofp %7 : vector<2x16xi32> to vector<2x16xf32>
    %cst = arith.constant 0.000000e+00 : f32
    %9 = vector.broadcast %cst : f32 to vector<2x16xf32>
    %10 = arith.cmpf oge, %8, %9 : vector<2x16xf32>
    %cst_0 = arith.constant 8.000000e+00 : f32
    %11 = vector.broadcast %cst_0 : f32 to vector<2x16xf32>
    %12 = arith.cmpf olt, %8, %11 : vector<2x16xf32>
    %13 = arith.andi %10, %12 : vector<2x16xi1>
    %14 = tpu.iota {dimensions = array<i32: 1>} : vector<7x8xi32>
    %15 = arith.sitofp %14 : vector<7x8xi32> to vector<7x8xf32>
    %c0 = arith.constant 0 : index
    %c0_1 = arith.constant 0 : index
    %c0_2 = arith.constant 0 : index
    %16 = vector.load %arg0[%c0, %c0_1, %c0_2] : memref<2x16x1xi32, #tpu.memory_space<vmem>>, vector<1x16x1xi32>
    %17 = vector.shape_cast %16 : vector<1x16x1xi32> to vector<16x1xi32>
    %18 = vector.broadcast %17 : vector<16x1xi32> to vector<16x50xi32>
    %19 = arith.cmpi eq, %18, %0 : vector<16x50xi32>
    %20 = arith.extui %19 : vector<16x50xi1> to vector<16x50xi32>
    %21 = arith.sitofp %20 : vector<16x50xi32> to vector<16x50xf32>
    %c0_3 = arith.constant 0 : index
    %c0_4 = arith.constant 0 : index
    %c0_5 = arith.constant 0 : index
    %22 = vector.load %arg1[%c0_3, %c0_4, %c0_5] : memref<2x16x1xi32, #tpu.memory_space<vmem>>, vector<1x16x1xi32>
    %23 = vector.shape_cast %22 : vector<1x16x1xi32> to vector<16x1xi32>
    %24 = vector.broadcast %23 : vector<16x1xi32> to vector<16x6xi32>
    %25 = arith.cmpi eq, %24, %1 : vector<16x6xi32>
    %26 = arith.extui %25 : vector<16x6xi1> to vector<16x6xi32>
    %27 = arith.sitofp %26 : vector<16x6xi32> to vector<16x6xf32>
    %c0_6 = arith.constant 0 : index
    %c0_7 = arith.constant 0 : index
    %c0_8 = arith.constant 0 : index
    %28 = vector.load %arg4[%c0_6, %c0_7, %c0_8] : memref<2x50x32xf32, #tpu.memory_space<vmem>>, vector<1x50x32xf32>
    %29 = vector.shape_cast %28 : vector<1x50x32xf32> to vector<50x32xf32>
    %cst_9 = arith.constant dense<0.000000e+00> : vector<16x32xf32>
    %30 = tpu.matmul %21, %29, %cst_9 {dimension_numbers = #tpu.dot_dimension_numbers<[1], [0], [0], [1], [0, 0, 1, 1], [], []>} : vector<16x50xf32>, vector<50x32xf32>, vector<16x32xf32> -> vector<16x32xf32>
    %c0_10 = arith.constant 0 : index
    %c0_11 = arith.constant 0 : index
    %c0_12 = arith.constant 0 : index
    %31 = vector.load %arg5[%c0_10, %c0_11, %c0_12] : memref<2x6x32xf32, #tpu.memory_space<vmem>>, vector<1x6x32xf32>
    %32 = vector.shape_cast %31 : vector<1x6x32xf32> to vector<6x32xf32>
    %cst_13 = arith.constant dense<0.000000e+00> : vector<16x32xf32>
    %33 = tpu.matmul %27, %32, %cst_13 {dimension_numbers = #tpu.dot_dimension_numbers<[1], [0], [0], [1], [0, 0, 1, 1], [], []>} : vector<16x6xf32>, vector<6x32xf32>, vector<16x32xf32> -> vector<16x32xf32>
    %34 = arith.addf %30, %33 : vector<16x32xf32>
    %c0_14 = arith.constant 0 : index
    %c0_15 = arith.constant 0 : index
    %c0_16 = arith.constant 0 : index
    %35 = vector.load %arg6[%c0_14, %c0_15, %c0_16] : memref<2x32x32xf32, #tpu.memory_space<vmem>>, vector<1x32x32xf32>
    %36 = vector.shape_cast %35 : vector<1x32x32xf32> to vector<32x32xf32>
    %cst_17 = arith.constant dense<0.000000e+00> : vector<16x32xf32>
    %37 = tpu.matmul %34, %36, %cst_17 {dimension_numbers = #tpu.dot_dimension_numbers<[1], [0], [0], [1], [0, 0, 1, 1], [], []>} : vector<16x32xf32>, vector<32x32xf32>, vector<16x32xf32> -> vector<16x32xf32>
    %c0_18 = arith.constant 0 : index
    %c0_19 = arith.constant 0 : index
    %c0_20 = arith.constant 0 : index
    %38 = vector.load %arg7[%c0_18, %c0_19, %c0_20] : memref<2x1x32xf32, #tpu.memory_space<vmem>>, vector<1x1x32xf32>
    %39 = vector.shape_cast %38 : vector<1x1x32xf32> to vector<1x32xf32>
    %40 = vector.broadcast %39 : vector<1x32xf32> to vector<16x32xf32>
    %41 = arith.addf %37, %40 : vector<16x32xf32>
    %42 = math.tanh %41 : vector<16x32xf32>
    %c0_21 = arith.constant 0 : index
    %c0_22 = arith.constant 0 : index
    %c0_23 = arith.constant 0 : index
    %43 = vector.load %arg3[%c0_21, %c0_22, %c0_23] : memref<2x2x1xf32, #tpu.memory_space<vmem>>, vector<1x2x1xf32>
    %44 = vector.shape_cast %43 : vector<1x2x1xf32> to vector<2x1xf32>
    %cst_24 = arith.constant 1.000000e+00 : f32
    %45 = vector.broadcast %cst_24 : f32 to vector<2x1xf32>
    %46 = arith.maximumf %44, %45 : vector<2x1xf32>
    %47 = vector.broadcast %44 : vector<2x1xf32> to vector<2x16xf32>
    %48 = arith.cmpf olt, %8, %47 : vector<2x16xf32>
    %49 = arith.andi %13, %48 : vector<2x16xi1>
    %50 = arith.extui %49 : vector<2x16xi1> to vector<2x16xi32>
    %51 = arith.sitofp %50 : vector<2x16xi32> to vector<2x16xf32>
    %cst_25 = arith.constant 1.000000e+00 : f32
    %52 = vector.broadcast %cst_25 : f32 to vector<2x1xf32>
    %53 = arith.maximumf %44, %52 : vector<2x1xf32>
    %54 = vector.broadcast %53 : vector<2x1xf32> to vector<2x16xf32>
    %55 = arith.divf %51, %54 : vector<2x16xf32>
    %cst_26 = arith.constant dense<0.000000e+00> : vector<2x32xf32>
    %56 = tpu.matmul %55, %42, %cst_26 {dimension_numbers = #tpu.dot_dimension_numbers<[1], [0], [0], [1], [0, 0, 1, 1], [], []>} : vector<2x16xf32>, vector<16x32xf32>, vector<2x32xf32> -> vector<2x32xf32>
    %c1 = arith.constant 1 : index
    %c0_27 = arith.constant 0 : index
    %c0_28 = arith.constant 0 : index
    %57 = vector.load %arg0[%c1, %c0_27, %c0_28] : memref<2x16x1xi32, #tpu.memory_space<vmem>>, vector<1x16x1xi32>
    %58 = vector.shape_cast %57 : vector<1x16x1xi32> to vector<16x1xi32>
    %59 = vector.broadcast %58 : vector<16x1xi32> to vector<16x50xi32>
    %60 = arith.cmpi eq, %59, %0 : vector<16x50xi32>
    %61 = arith.extui %60 : vector<16x50xi1> to vector<16x50xi32>
    %62 = arith.sitofp %61 : vector<16x50xi32> to vector<16x50xf32>
    %c1_29 = arith.constant 1 : index
    %c0_30 = arith.constant 0 : index
    %c0_31 = arith.constant 0 : index
    %63 = vector.load %arg1[%c1_29, %c0_30, %c0_31] : memref<2x16x1xi32, #tpu.memory_space<vmem>>, vector<1x16x1xi32>
    %64 = vector.shape_cast %63 : vector<1x16x1xi32> to vector<16x1xi32>
    %65 = vector.broadcast %64 : vector<16x1xi32> to vector<16x6xi32>
    %66 = arith.cmpi eq, %65, %1 : vector<16x6xi32>
    %67 = arith.extui %66 : vector<16x6xi1> to vector<16x6xi32>
    %68 = arith.sitofp %67 : vector<16x6xi32> to vector<16x6xf32>
    %c1_32 = arith.constant 1 : index
    %c0_33 = arith.constant 0 : index
    %c0_34 = arith.constant 0 : index
    %69 = vector.load %arg4[%c1_32, %c0_33, %c0_34] : memref<2x50x32xf32, #tpu.memory_space<vmem>>, vector<1x50x32xf32>
    %70 = vector.shape_cast %69 : vector<1x50x32xf32> to vector<50x32xf32>
    %cst_35 = arith.constant dense<0.000000e+00> : vector<16x32xf32>
    %71 = tpu.matmul %62, %70, %cst_35 {dimension_numbers = #tpu.dot_dimension_numbers<[1], [0], [0], [1], [0, 0, 1, 1], [], []>} : vector<16x50xf32>, vector<50x32xf32>, vector<16x32xf32> -> vector<16x32xf32>
    %c1_36 = arith.constant 1 : index
    %c0_37 = arith.constant 0 : index
    %c0_38 = arith.constant 0 : index
    %72 = vector.load %arg5[%c1_36, %c0_37, %c0_38] : memref<2x6x32xf32, #tpu.memory_space<vmem>>, vector<1x6x32xf32>
    %73 = vector.shape_cast %72 : vector<1x6x32xf32> to vector<6x32xf32>
    %cst_39 = arith.constant dense<0.000000e+00> : vector<16x32xf32>
    %74 = tpu.matmul %68, %73, %cst_39 {dimension_numbers = #tpu.dot_dimension_numbers<[1], [0], [0], [1], [0, 0, 1, 1], [], []>} : vector<16x6xf32>, vector<6x32xf32>, vector<16x32xf32> -> vector<16x32xf32>
    %75 = arith.addf %71, %74 : vector<16x32xf32>
    %c1_40 = arith.constant 1 : index
    %c0_41 = arith.constant 0 : index
    %c0_42 = arith.constant 0 : index
    %76 = vector.load %arg6[%c1_40, %c0_41, %c0_42] : memref<2x32x32xf32, #tpu.memory_space<vmem>>, vector<1x32x32xf32>
    %77 = vector.shape_cast %76 : vector<1x32x32xf32> to vector<32x32xf32>
    %cst_43 = arith.constant dense<0.000000e+00> : vector<16x32xf32>
    %78 = tpu.matmul %75, %77, %cst_43 {dimension_numbers = #tpu.dot_dimension_numbers<[1], [0], [0], [1], [0, 0, 1, 1], [], []>} : vector<16x32xf32>, vector<32x32xf32>, vector<16x32xf32> -> vector<16x32xf32>
    %c1_44 = arith.constant 1 : index
    %c0_45 = arith.constant 0 : index
    %c0_46 = arith.constant 0 : index
    %79 = vector.load %arg7[%c1_44, %c0_45, %c0_46] : memref<2x1x32xf32, #tpu.memory_space<vmem>>, vector<1x1x32xf32>
    %80 = vector.shape_cast %79 : vector<1x1x32xf32> to vector<1x32xf32>
    %81 = vector.broadcast %80 : vector<1x32xf32> to vector<16x32xf32>
    %82 = arith.addf %78, %81 : vector<16x32xf32>
    %83 = math.tanh %82 : vector<16x32xf32>
    %c1_47 = arith.constant 1 : index
    %c0_48 = arith.constant 0 : index
    %c0_49 = arith.constant 0 : index
    %84 = vector.load %arg3[%c1_47, %c0_48, %c0_49] : memref<2x2x1xf32, #tpu.memory_space<vmem>>, vector<1x2x1xf32>
    %85 = vector.shape_cast %84 : vector<1x2x1xf32> to vector<2x1xf32>
    %cst_50 = arith.constant 1.000000e+00 : f32
    %86 = vector.broadcast %cst_50 : f32 to vector<2x1xf32>
    %87 = arith.maximumf %85, %86 : vector<2x1xf32>
    %88 = vector.broadcast %85 : vector<2x1xf32> to vector<2x16xf32>
    %89 = arith.cmpf olt, %8, %88 : vector<2x16xf32>
    %90 = arith.andi %13, %89 : vector<2x16xi1>
    %91 = arith.extui %90 : vector<2x16xi1> to vector<2x16xi32>
    %92 = arith.sitofp %91 : vector<2x16xi32> to vector<2x16xf32>
    %cst_51 = arith.constant 1.000000e+00 : f32
    %93 = vector.broadcast %cst_51 : f32 to vector<2x1xf32>
    %94 = arith.maximumf %85, %93 : vector<2x1xf32>
    %95 = vector.broadcast %94 : vector<2x1xf32> to vector<2x16xf32>
    %96 = arith.divf %92, %95 : vector<2x16xf32>
    %cst_52 = arith.constant dense<0.000000e+00> : vector<2x32xf32>
    %97 = tpu.matmul %96, %83, %cst_52 {dimension_numbers = #tpu.dot_dimension_numbers<[1], [0], [0], [1], [0, 0, 1, 1], [], []>} : vector<2x16xf32>, vector<16x32xf32>, vector<2x32xf32> -> vector<2x32xf32>
    %98 = arith.addf %56, %97 : vector<2x32xf32>
    %cst_53 = arith.constant 5.000000e-01 : f32
    %99 = vector.broadcast %cst_53 : f32 to vector<2x32xf32>
    %100 = arith.mulf %98, %99 : vector<2x32xf32>
    %c0_54 = arith.constant 0 : index
    %c0_55 = arith.constant 0 : index
    %101 = vector.load %arg2[%c0_54, %c0_55] : memref<14x1xi32, #tpu.memory_space<vmem>>, vector<14x1xi32>
    %102 = vector.broadcast %101 : vector<14x1xi32> to vector<14x50xi32>
    %103 = arith.cmpi eq, %102, %2 : vector<14x50xi32>
    %104 = arith.extui %103 : vector<14x50xi1> to vector<14x50xi32>
    %105 = arith.sitofp %104 : vector<14x50xi32> to vector<14x50xf32>
    %c0_56 = arith.constant 0 : index
    %c0_57 = arith.constant 0 : index
    %106 = vector.load %arg8[%c0_56, %c0_57] : memref<50x32xf32, #tpu.memory_space<vmem>>, vector<50x32xf32>
    %cst_58 = arith.constant dense<0.000000e+00> : vector<14x32xf32>
    %107 = tpu.matmul %105, %106, %cst_58 {dimension_numbers = #tpu.dot_dimension_numbers<[1], [0], [0], [1], [0, 0, 1, 1], [], []>} : vector<14x50xf32>, vector<50x32xf32>, vector<14x32xf32> -> vector<14x32xf32>
    %c0_59 = arith.constant 0 : index
    %c0_60 = arith.constant 0 : index
    %108 = vector.load %arg10[%c0_59, %c0_60] : memref<1x32xf32, #tpu.memory_space<vmem>>, vector<1x32xf32>
    %109 = vector.extract_strided_slice %107 {offsets = [0, 0], sizes = [7, 32], strides = [1, 1]} : vector<14x32xf32> to vector<7x32xf32>
    %110 = vector.extract_strided_slice %100 {offsets = [0, 0], sizes = [1, 32], strides = [1, 1]} : vector<2x32xf32> to vector<1x32xf32>
    %111 = vector.broadcast %110 : vector<1x32xf32> to vector<7x32xf32>
    %112 = arith.addf %109, %111 : vector<7x32xf32>
    %cst_61 = arith.constant 0.176776692 : f32
    %113 = vector.broadcast %cst_61 : f32 to vector<7x32xf32>
    %114 = arith.mulf %112, %113 : vector<7x32xf32>
    %c0_62 = arith.constant 0 : index
    %c0_63 = arith.constant 0 : index
    %115 = vector.load %arg9[%c0_62, %c0_63] : memref<96x32xf32, #tpu.memory_space<vmem>>, vector<32x32xf32>
    %cst_64 = arith.constant dense<0.000000e+00> : vector<7x32xf32>
    %116 = tpu.matmul %112, %115, %cst_64 {dimension_numbers = #tpu.dot_dimension_numbers<[1], [0], [0], [1], [0, 0, 1, 1], [], []>} : vector<7x32xf32>, vector<32x32xf32>, vector<7x32xf32> -> vector<7x32xf32>
    %117 = vector.extract_strided_slice %42 {offsets = [0, 0], sizes = [8, 32], strides = [1, 1]} : vector<16x32xf32> to vector<8x32xf32>
    %118 = vector.extract_strided_slice %46 {offsets = [0, 0], sizes = [1, 1], strides = [1, 1]} : vector<2x1xf32> to vector<1x1xf32>
    %119 = vector.broadcast %118 : vector<1x1xf32> to vector<7x8xf32>
    %120 = arith.cmpf olt, %15, %119 : vector<7x8xf32>
    %cst_65 = arith.constant dense<0.000000e+00> : vector<7x8xf32>
    %121 = tpu.matmul %114, %117, %cst_65 {dimension_numbers = #tpu.dot_dimension_numbers<[1], [1], [0], [0], [0, 0, 1, 0], [], []>} : vector<7x32xf32>, vector<8x32xf32>, vector<7x8xf32> -> vector<7x8xf32>
    %cst_66 = arith.constant -1.000000e+30 : f32
    %122 = vector.broadcast %cst_66 : f32 to vector<7x8xf32>
    %123 = arith.select %120, %121, %122 : vector<7x8xi1>, vector<7x8xf32>
    %cst_67 = arith.constant dense<0xFF800000> : vector<7xf32>
    %124 = vector.multi_reduction <maximumf>, %123, %cst_67 [1] : vector<7x8xf32> to vector<7xf32>
    %125 = vector.shape_cast %124 : vector<7xf32> to vector<7x1xf32>
    %126 = vector.broadcast %125 : vector<7x1xf32> to vector<7x8xf32>
    %127 = arith.subf %123, %126 : vector<7x8xf32>
    %128 = math.exp %127 : vector<7x8xf32>
    %cst_68 = arith.constant dense<0.000000e+00> : vector<7xf32>
    %129 = vector.multi_reduction <add>, %128, %cst_68 [1] : vector<7x8xf32> to vector<7xf32>
    %130 = vector.shape_cast %129 : vector<7xf32> to vector<7x1xf32>
    %131 = tpu.reciprocal %130 : vector<7x1xf32> -> vector<7x1xf32>
    %132 = vector.broadcast %131 : vector<7x1xf32> to vector<7x8xf32>
    %133 = arith.mulf %128, %132 : vector<7x8xf32>
    %cst_69 = arith.constant dense<0.000000e+00> : vector<7x32xf32>
    %134 = tpu.matmul %133, %117, %cst_69 {dimension_numbers = #tpu.dot_dimension_numbers<[1], [0], [0], [1], [0, 0, 1, 1], [], []>} : vector<7x8xf32>, vector<8x32xf32>, vector<7x32xf32> -> vector<7x32xf32>
    %c32 = arith.constant 32 : index
    %c0_70 = arith.constant 0 : index
    %135 = vector.load %arg9[%c32, %c0_70] : memref<96x32xf32, #tpu.memory_space<vmem>>, vector<32x32xf32>
    %cst_71 = arith.constant dense<0.000000e+00> : vector<7x32xf32>
    %136 = tpu.matmul %134, %135, %cst_71 {dimension_numbers = #tpu.dot_dimension_numbers<[1], [0], [0], [1], [0, 0, 1, 1], [], []>} : vector<7x32xf32>, vector<32x32xf32>, vector<7x32xf32> -> vector<7x32xf32>
    %137 = arith.addf %116, %136 : vector<7x32xf32>
    %138 = vector.extract_strided_slice %83 {offsets = [0, 0], sizes = [8, 32], strides = [1, 1]} : vector<16x32xf32> to vector<8x32xf32>
    %139 = vector.extract_strided_slice %87 {offsets = [0, 0], sizes = [1, 1], strides = [1, 1]} : vector<2x1xf32> to vector<1x1xf32>
    %140 = vector.broadcast %139 : vector<1x1xf32> to vector<7x8xf32>
    %141 = arith.cmpf olt, %15, %140 : vector<7x8xf32>
    %cst_72 = arith.constant dense<0.000000e+00> : vector<7x8xf32>
    %142 = tpu.matmul %114, %138, %cst_72 {dimension_numbers = #tpu.dot_dimension_numbers<[1], [1], [0], [0], [0, 0, 1, 0], [], []>} : vector<7x32xf32>, vector<8x32xf32>, vector<7x8xf32> -> vector<7x8xf32>
    %cst_73 = arith.constant -1.000000e+30 : f32
    %143 = vector.broadcast %cst_73 : f32 to vector<7x8xf32>
    %144 = arith.select %141, %142, %143 : vector<7x8xi1>, vector<7x8xf32>
    %cst_74 = arith.constant dense<0xFF800000> : vector<7xf32>
    %145 = vector.multi_reduction <maximumf>, %144, %cst_74 [1] : vector<7x8xf32> to vector<7xf32>
    %146 = vector.shape_cast %145 : vector<7xf32> to vector<7x1xf32>
    %147 = vector.broadcast %146 : vector<7x1xf32> to vector<7x8xf32>
    %148 = arith.subf %144, %147 : vector<7x8xf32>
    %149 = math.exp %148 : vector<7x8xf32>
    %cst_75 = arith.constant dense<0.000000e+00> : vector<7xf32>
    %150 = vector.multi_reduction <add>, %149, %cst_75 [1] : vector<7x8xf32> to vector<7xf32>
    %151 = vector.shape_cast %150 : vector<7xf32> to vector<7x1xf32>
    %152 = tpu.reciprocal %151 : vector<7x1xf32> -> vector<7x1xf32>
    %153 = vector.broadcast %152 : vector<7x1xf32> to vector<7x8xf32>
    %154 = arith.mulf %149, %153 : vector<7x8xf32>
    %cst_76 = arith.constant dense<0.000000e+00> : vector<7x32xf32>
    %155 = tpu.matmul %154, %138, %cst_76 {dimension_numbers = #tpu.dot_dimension_numbers<[1], [0], [0], [1], [0, 0, 1, 1], [], []>} : vector<7x8xf32>, vector<8x32xf32>, vector<7x32xf32> -> vector<7x32xf32>
    %c64 = arith.constant 64 : index
    %c0_77 = arith.constant 0 : index
    %156 = vector.load %arg9[%c64, %c0_77] : memref<96x32xf32, #tpu.memory_space<vmem>>, vector<32x32xf32>
    %cst_78 = arith.constant dense<0.000000e+00> : vector<7x32xf32>
    %157 = tpu.matmul %155, %156, %cst_78 {dimension_numbers = #tpu.dot_dimension_numbers<[1], [0], [0], [1], [0, 0, 1, 1], [], []>} : vector<7x32xf32>, vector<32x32xf32>, vector<7x32xf32> -> vector<7x32xf32>
    %158 = arith.addf %137, %157 : vector<7x32xf32>
    %159 = vector.broadcast %108 : vector<1x32xf32> to vector<7x32xf32>
    %160 = arith.addf %158, %159 : vector<7x32xf32>
    %161 = math.tanh %160 : vector<7x32xf32>
    %162 = vector.extract_strided_slice %107 {offsets = [7, 0], sizes = [7, 32], strides = [1, 1]} : vector<14x32xf32> to vector<7x32xf32>
    %163 = vector.extract_strided_slice %100 {offsets = [1, 0], sizes = [1, 32], strides = [1, 1]} : vector<2x32xf32> to vector<1x32xf32>
    %164 = vector.broadcast %163 : vector<1x32xf32> to vector<7x32xf32>
    %165 = arith.addf %162, %164 : vector<7x32xf32>
    %cst_79 = arith.constant 0.176776692 : f32
    %166 = vector.broadcast %cst_79 : f32 to vector<7x32xf32>
    %167 = arith.mulf %165, %166 : vector<7x32xf32>
    %c0_80 = arith.constant 0 : index
    %c0_81 = arith.constant 0 : index
    %168 = vector.load %arg9[%c0_80, %c0_81] : memref<96x32xf32, #tpu.memory_space<vmem>>, vector<32x32xf32>
    %cst_82 = arith.constant dense<0.000000e+00> : vector<7x32xf32>
    %169 = tpu.matmul %165, %168, %cst_82 {dimension_numbers = #tpu.dot_dimension_numbers<[1], [0], [0], [1], [0, 0, 1, 1], [], []>} : vector<7x32xf32>, vector<32x32xf32>, vector<7x32xf32> -> vector<7x32xf32>
    %170 = vector.extract_strided_slice %42 {offsets = [8, 0], sizes = [8, 32], strides = [1, 1]} : vector<16x32xf32> to vector<8x32xf32>
    %171 = vector.extract_strided_slice %46 {offsets = [1, 0], sizes = [1, 1], strides = [1, 1]} : vector<2x1xf32> to vector<1x1xf32>
    %172 = vector.broadcast %171 : vector<1x1xf32> to vector<7x8xf32>
    %173 = arith.cmpf olt, %15, %172 : vector<7x8xf32>
    %cst_83 = arith.constant dense<0.000000e+00> : vector<7x8xf32>
    %174 = tpu.matmul %167, %170, %cst_83 {dimension_numbers = #tpu.dot_dimension_numbers<[1], [1], [0], [0], [0, 0, 1, 0], [], []>} : vector<7x32xf32>, vector<8x32xf32>, vector<7x8xf32> -> vector<7x8xf32>
    %cst_84 = arith.constant -1.000000e+30 : f32
    %175 = vector.broadcast %cst_84 : f32 to vector<7x8xf32>
    %176 = arith.select %173, %174, %175 : vector<7x8xi1>, vector<7x8xf32>
    %cst_85 = arith.constant dense<0xFF800000> : vector<7xf32>
    %177 = vector.multi_reduction <maximumf>, %176, %cst_85 [1] : vector<7x8xf32> to vector<7xf32>
    %178 = vector.shape_cast %177 : vector<7xf32> to vector<7x1xf32>
    %179 = vector.broadcast %178 : vector<7x1xf32> to vector<7x8xf32>
    %180 = arith.subf %176, %179 : vector<7x8xf32>
    %181 = math.exp %180 : vector<7x8xf32>
    %cst_86 = arith.constant dense<0.000000e+00> : vector<7xf32>
    %182 = vector.multi_reduction <add>, %181, %cst_86 [1] : vector<7x8xf32> to vector<7xf32>
    %183 = vector.shape_cast %182 : vector<7xf32> to vector<7x1xf32>
    %184 = tpu.reciprocal %183 : vector<7x1xf32> -> vector<7x1xf32>
    %185 = vector.broadcast %184 : vector<7x1xf32> to vector<7x8xf32>
    %186 = arith.mulf %181, %185 : vector<7x8xf32>
    %cst_87 = arith.constant dense<0.000000e+00> : vector<7x32xf32>
    %187 = tpu.matmul %186, %170, %cst_87 {dimension_numbers = #tpu.dot_dimension_numbers<[1], [0], [0], [1], [0, 0, 1, 1], [], []>} : vector<7x8xf32>, vector<8x32xf32>, vector<7x32xf32> -> vector<7x32xf32>
    %c32_88 = arith.constant 32 : index
    %c0_89 = arith.constant 0 : index
    %188 = vector.load %arg9[%c32_88, %c0_89] : memref<96x32xf32, #tpu.memory_space<vmem>>, vector<32x32xf32>
    %cst_90 = arith.constant dense<0.000000e+00> : vector<7x32xf32>
    %189 = tpu.matmul %187, %188, %cst_90 {dimension_numbers = #tpu.dot_dimension_numbers<[1], [0], [0], [1], [0, 0, 1, 1], [], []>} : vector<7x32xf32>, vector<32x32xf32>, vector<7x32xf32> -> vector<7x32xf32>
    %190 = arith.addf %169, %189 : vector<7x32xf32>
    %191 = vector.extract_strided_slice %83 {offsets = [8, 0], sizes = [8, 32], strides = [1, 1]} : vector<16x32xf32> to vector<8x32xf32>
    %192 = vector.extract_strided_slice %87 {offsets = [1, 0], sizes = [1, 1], strides = [1, 1]} : vector<2x1xf32> to vector<1x1xf32>
    %193 = vector.broadcast %192 : vector<1x1xf32> to vector<7x8xf32>
    %194 = arith.cmpf olt, %15, %193 : vector<7x8xf32>
    %cst_91 = arith.constant dense<0.000000e+00> : vector<7x8xf32>
    %195 = tpu.matmul %167, %191, %cst_91 {dimension_numbers = #tpu.dot_dimension_numbers<[1], [1], [0], [0], [0, 0, 1, 0], [], []>} : vector<7x32xf32>, vector<8x32xf32>, vector<7x8xf32> -> vector<7x8xf32>
    %cst_92 = arith.constant -1.000000e+30 : f32
    %196 = vector.broadcast %cst_92 : f32 to vector<7x8xf32>
    %197 = arith.select %194, %195, %196 : vector<7x8xi1>, vector<7x8xf32>
    %cst_93 = arith.constant dense<0xFF800000> : vector<7xf32>
    %198 = vector.multi_reduction <maximumf>, %197, %cst_93 [1] : vector<7x8xf32> to vector<7xf32>
    %199 = vector.shape_cast %198 : vector<7xf32> to vector<7x1xf32>
    %200 = vector.broadcast %199 : vector<7x1xf32> to vector<7x8xf32>
    %201 = arith.subf %197, %200 : vector<7x8xf32>
    %202 = math.exp %201 : vector<7x8xf32>
    %cst_94 = arith.constant dense<0.000000e+00> : vector<7xf32>
    %203 = vector.multi_reduction <add>, %202, %cst_94 [1] : vector<7x8xf32> to vector<7xf32>
    %204 = vector.shape_cast %203 : vector<7xf32> to vector<7x1xf32>
    %205 = tpu.reciprocal %204 : vector<7x1xf32> -> vector<7x1xf32>
    %206 = vector.broadcast %205 : vector<7x1xf32> to vector<7x8xf32>
    %207 = arith.mulf %202, %206 : vector<7x8xf32>
    %cst_95 = arith.constant dense<0.000000e+00> : vector<7x32xf32>
    %208 = tpu.matmul %207, %191, %cst_95 {dimension_numbers = #tpu.dot_dimension_numbers<[1], [0], [0], [1], [0, 0, 1, 1], [], []>} : vector<7x8xf32>, vector<8x32xf32>, vector<7x32xf32> -> vector<7x32xf32>
    %c64_96 = arith.constant 64 : index
    %c0_97 = arith.constant 0 : index
    %209 = vector.load %arg9[%c64_96, %c0_97] : memref<96x32xf32, #tpu.memory_space<vmem>>, vector<32x32xf32>
    %cst_98 = arith.constant dense<0.000000e+00> : vector<7x32xf32>
    %210 = tpu.matmul %208, %209, %cst_98 {dimension_numbers = #tpu.dot_dimension_numbers<[1], [0], [0], [1], [0, 0, 1, 1], [], []>} : vector<7x32xf32>, vector<32x32xf32>, vector<7x32xf32> -> vector<7x32xf32>
    %211 = arith.addf %190, %210 : vector<7x32xf32>
    %212 = vector.broadcast %108 : vector<1x32xf32> to vector<7x32xf32>
    %213 = arith.addf %211, %212 : vector<7x32xf32>
    %214 = math.tanh %213 : vector<7x32xf32>
    %215 = vector.shape_cast %161 : vector<7x32xf32> to vector<7x1x32xf32>
    %216 = vector.shape_cast %214 : vector<7x32xf32> to vector<7x1x32xf32>
    %217 = tpu.concatenate %215, %216 in 1 : vector<7x1x32xf32>, vector<7x1x32xf32> -> vector<7x2x32xf32>
    %c0_99 = arith.constant 0 : index
    %c0_100 = arith.constant 0 : index
    %c0_101 = arith.constant 0 : index
    %218 = vector.load %arg11[%c0_99, %c0_100, %c0_101] : memref<7x2x32xf32, #tpu.memory_space<vmem>>, vector<7x2x32xf32>
    tpu.vector_store %arg11[%c0_99, %c0_100, %c0_101], %217 {strides = array<i32>} : memref<7x2x32xf32, #tpu.memory_space<vmem>>, vector<7x2x32xf32>,
    %219 = vector.shape_cast %133 : vector<7x8xf32> to vector<7x1x8xf32>
    %220 = vector.shape_cast %186 : vector<7x8xf32> to vector<7x1x8xf32>
    %221 = tpu.concatenate %219, %220 in 1 : vector<7x1x8xf32>, vector<7x1x8xf32> -> vector<7x2x8xf32>
    %222 = vector.shape_cast %154 : vector<7x8xf32> to vector<7x1x8xf32>
    %223 = vector.shape_cast %207 : vector<7x8xf32> to vector<7x1x8xf32>
    %224 = tpu.concatenate %222, %223 in 1 : vector<7x1x8xf32>, vector<7x1x8xf32> -> vector<7x2x8xf32>
    %225 = vector.shape_cast %221 : vector<7x2x8xf32> to vector<1x7x2x8xf32>
    %226 = vector.shape_cast %224 : vector<7x2x8xf32> to vector<1x7x2x8xf32>
    %227 = tpu.concatenate %225, %226 in 0 : vector<1x7x2x8xf32>, vector<1x7x2x8xf32> -> vector<2x7x2x8xf32>
    %c0_102 = arith.constant 0 : index
    %c0_103 = arith.constant 0 : index
    %c0_104 = arith.constant 0 : index
    %c0_105 = arith.constant 0 : index
    %228 = vector.load %arg12[%c0_102, %c0_103, %c0_104, %c0_105] : memref<2x7x2x8xf32, #tpu.memory_space<vmem>>, vector<2x7x2x8xf32>
    tpu.vector_store %arg12[%c0_102, %c0_103, %c0_104, %c0_105], %227 {strides = array<i32>} : memref<2x7x2x8xf32, #tpu.memory_space<vmem>>, vector<2x7x2x8xf32>,
    return
  }
}

</mosaic_0001>

<bundles_post_ra>
// kernel: _fused_forward.1
= control target key start
LH: loop header
LB: loop body
LE: loop exit
PB: predicated region body
PF: predicated region fallthrough
CT: control target
= control target key end

     0   :  { %18 = vsyncpa [#allocation3], 0  ;;  %v3052_v2 = vmov 0   ;;  %vm182_vm0 = vcmask 1041408   ;;  %vm96_vm1 = vcmask 1045504   ;;  %s3697_s0 = inlined_call_operand.vmem [shape: s32[2,16,1], index: 0, kind: input, shape index: {}]   ;;  %s3698_s1 = inlined_call_operand.vmem [shape: s32[2,16,1], index: 1, kind: input, shape index: {}]   ;;  %s3699_s2 = inlined_call_operand.vmem [shape: s32[14,1], index: 2, kind: input, shape index: {}]   ;;  %s3700_s3 = inlined_call_operand.vmem [shape: f32[2,2,1], index: 3, kind: input, shape index: {}]   ;;  %s3701_s4 = inlined_call_operand.vmem [shape: f32[2,50,32], index: 4, kind: input, shape index: {}]   ;;  %s3702_s5 = inlined_call_operand.vmem [shape: f32[2,6,32], index: 5, kind: input, shape index: {}]   ;;  %s3703_s6 = inlined_call_operand.vmem [shape: f32[2,32,32], index: 6, kind: input, shape index: {}]   ;;  %s3704_s7 = inlined_call_operand.vmem [shape: f32[2,1,32], index: 7, kind: input, shape index: {}]   ;;  %s3705_s8 = inlined_call_operand.vmem [shape: f32[50,32], index: 8, kind: input, shape index: {}]   ;;  %s3706_s9 = inlined_call_operand.vmem [shape: f32[96,32], index: 9, kind: input, shape index: {}]   ;;  %s3707_s10 = inlined_call_operand.vmem [shape: f32[1,32], index: 10, kind: input, shape index: {}]   ;;  %s3708_s11 = inlined_call_operand.hbm [shape: f32[7,2,32], index: 11, kind: output, shape index: {0}]   ;;  %s3709_s12 = inlined_call_operand.hbm [shape: f32[2,7,2,8], index: 12, kind: output, shape index: {1}]  }
   0x1   :  { %v54_v0 = vld [vmem:[%s3697_s0 + $0x8] sm:$0xff]  ;;  %v53_v1 = vld [vmem:[%s3697_s0] sm:$0xff]  ;;  %2975 = vset.pattern.permute.xlu1 %v3052_v2  ;;  %2974 = vset.pattern.permute.xlu0 %v3052_v2  ;;  %v87_v9 = vld [vmem:[%s3701_s4 + $0x30] sm:$0x3] }
   0x2   :  { %59 = vperm.xlu1 %2975, %v54_v0   ;;  %56 = vperm.xlu0 %2974, %v53_v1   ;;  %v356_v3 = vld [vmem:[%s3700_s3] sm:$0x3]  ;;  %v68_v4 = vld [vmem:[%s3698_s1 + $0x8] sm:$0xff]  ;;  %v2630_v7 = vld [vmem:[%s3700_s3 + $0x2] sm:$0x3] }
   0x3   :  { %v67_v5 = vld [vmem:[%s3698_s1] sm:$0xff]  ;;  %v3140_v6 = vmax.f32 %v356_v3, 1.0  ;;  %v3145_v8 = vmax.f32 %v2630_v7, 1.0  ;;  %2760 = vmatprep.subr.msk.mxu1 %vm182_vm0, %v87_v9  ;;  %v86_v10 = vld [vmem:[%s3701_s4 + $0x28] sm:$0xff] }
   0x4   :  { %v88_v11 = vld [vmem:[%s3702_s5] sm:$0x3f] }
   0x5   :  { %2958 = vpush %v3140_v6 }
   0x6   :  { %73 = vperm.xlu1 %2975, %v68_v4   ;;  %70 = vperm.xlu0 %2974, %v67_v5   ;;  %2960 = vpush %v3145_v8 }
   0x7   :  { %19 = vsyncpa [#allocation5], 0  ;;  %v2605_v12 = vld [vmem:[%s3698_s1 + $0x18] sm:$0xff]  ;;  %v2604_v13 = vld [vmem:[%s3698_s1 + $0x10] sm:$0xff]  ;;  %2761 = vmatpush3.msk.msra.mxu1 %vm182_vm0, %v87_v9  ;;  %2755 = vmatprep.subr.msk.mxu0 %vm96_vm1, %v88_v11  ;;  %v42_v23 = vlaneseq  ;;  %vm175_vm2 = vcmask 408576   ;;  %v3053_v27 = vmov 0.0  }
   0x8   :  { %2762 = vmatprep.subr.mxu1 %v86_v10  ;;  %v85_v14 = vld [vmem:[%s3701_s4 + $0x20] sm:$0xff]  ;;  %2756 = vmatpush3.msk.msra.mxu0 %vm96_vm1, %v88_v11  ;;  %v84_v15 = vld [vmem:[%s3701_s4 + $0x18] sm:$0xff]  ;;  %v2600_v17 = vld [vmem:[%s3697_s0 + $0x10] sm:$0xff]  ;;  %vm89_vm5 = vcmask 48128   ;;  %vm272_vm15 = vcmask 261120  }
   0x9   :  { %2763 = vmatpush3.msra.mxu1 %v86_v10  ;;  %v2601_v16 = vld [vmem:[%s3697_s0 + $0x18] sm:$0xff]  ;;  %v83_v18 = vld [vmem:[%s3701_s4 + $0x10] sm:$0xff]  ;;  %v82_v19 = vld [vmem:[%s3701_s4 + $0x8] sm:$0xff]  ;;  %v3197_v24 = vand.u32 127, %v42_v23  ;;  %v3207_v32 = vshrl.u32 %v42_v23, 7 }
   0xa   :  { %396 = vperm.xlu1 %2975, %v2605_v12   ;;  %393 = vperm.xlu0 %2974, %v2604_v13   ;;  %v81_v20 = vld [vmem:[%s3701_s4] sm:$0xff]  ;;  %v846_v21 = vld [vmem:[%s3699_s2 + $0x8] sm:$0x3f]  ;;  %v264_v52 = vld [vmem:[%s3703_s6 + $0x18] sm:$0xff] }
   0xb   :  { %2764 = vmatprep.subr.mxu1 %v85_v14  ;;  %v845_v22 = vld [vmem:[%s3699_s2] sm:$0xff]  ;;  %v46_v37 = vmul.u32 8, %v3207_v32  ;;  %2777 = vmatprep.subr.mxu0 %v264_v52  ;;  %v263_v53 = vld [vmem:[%s3703_s6 + $0x10] sm:$0xff]  ;;  %v262_v54 = vld [vmem:[%s3703_s6 + $0x8] sm:$0xff] }
   0xc   :  { %2765 = vmatpush3.msra.mxu1 %v85_v14  ;;  %v261_v55 = vld [vmem:[%s3703_s6] sm:$0xff]  ;;  %v2615_v56 = vld [vmem:[%s3702_s5 + $0x8] sm:$0x3f]  ;;  %v2612_v4 = vld [vmem:[%s3701_s4 + $0x58] sm:$0xff] }
   0xd   :  { %2766 = vmatprep.subr.mxu1 %v84_v15  ;;  %v47_v40 = vsub.s32 %v3197_v24, %v46_v37  ;;  %v2614_v63 = vld [vmem:[%s3701_s4 + $0x68] sm:$0x3]  ;;  %v2613_v2 = vld [vmem:[%s3701_s4 + $0x60] sm:$0xff]  ;;  %v2611_v5 = vld [vmem:[%s3701_s4 + $0x50] sm:$0xff] }
   0xe   :  { %381 = vperm.xlu1 %2975, %v2601_v16   ;;  %378 = vperm.xlu0 %2974, %v2600_v17   ;;  %v2609_v9 = vld [vmem:[%s3701_s4 + $0x40] sm:$0xff]  ;;  %v2608_v11 = vld [vmem:[%s3701_s4 + $0x38] sm:$0xff]  ;;  %v865_v12 = vld [vmem:[%s3705_s8 + $0x30] sm:$0x3] }
   0xf   :  { %2767 = vmatpush3.msra.mxu1 %v84_v15  ;;  %v48_v43 = vcvt.s32.f32 %v47_v40  ;;  %v864_v14 = vld [vmem:[%s3705_s8 + $0x28] sm:$0xff]  ;;  %v863_v16 = vld [vmem:[%s3705_s8 + $0x20] sm:$0xff]  ;;  %v862_v17 = vld [vmem:[%s3705_s8 + $0x18] sm:$0xff] }
  0x10   :  { %2768 = vmatprep.subr.mxu1 %v83_v18  ;;  %v2625_v23 = vld [vmem:[%s3703_s6 + $0x38] sm:$0xff] }
  0x11   :  { %2769 = vmatpush3.msra.mxu1 %v83_v18  ;;  %vm49_vm8 = vcmp.ge.f32.partialorder %v48_v43, 0.0  ;;  %vm50_vm9 = vcmp.lt.f32.partialorder %v48_v43, 8.0  ;;  %v861_v18 = vld [vmem:[%s3705_s8 + $0x10] sm:$0xff] }
  0x12   :  { %369 = vperm.xlu1 %2975, %v3140_v6   ;;  %692 = vperm.xlu0 %2974, %v3145_v8   ;;  %vm51_vm10 = vmand %vm49_vm8, %vm50_vm9  ;;  %vm1541_vm8 = vcmask 1040384  }
  0x13   :  { %2770 = vmatprep.subr.mxu1 %v82_v19 }
  0x14   :  { %2771 = vmatpush3.msra.mxu1 %v82_v19 }
  0x15   :  { %2772 = vmatprep.subr.mxu1 %v81_v20 }
  0x16   :  { %360 = vperm.xlu1 %2975, %v356_v3   ;;  %683 = vperm.xlu0 %2974, %v2630_v7   ;;  %v2610_v7 = vld [vmem:[%s3701_s4 + $0x48] sm:$0xff] }
  0x17   :  { %2773 = vmatpush3.msra.mxu1 %v81_v20  ;;  %v860_v20 = vld [vmem:[%s3705_s8 + $0x8] sm:$0xff] }
  0x18   :  { %2810 = vmatprep.subr.mxu1 %v2625_v23 }
  0x1a   :  { %851 = vperm.xlu1 %2975, %v846_v21   ;;  %848 = vperm.xlu0 %2974, %v845_v22   ;;  %v859_v21 = vld [vmem:[%s3705_s8] sm:$0xff] }
  0x36   :  { %s2959_s27 = spop %2958 }
  0x37   :  { %s2961_s16 = spop %2960 }
  0x7d   :  { %v60_v25 = vpop.permute.xlu1 %59  ;;  %v57_v26 = vpop.permute.xlu0 %56 }
  0x7e   :  { %vm62_vm3 = vcmp.eq.s32.totalorder %v60_v25, %v3197_v24  ;;  %vm61_vm4 = vcmp.eq.s32.totalorder %v57_v26, %v3197_v24  ;;  %v2624_v25 = vld [vmem:[%s3703_s6 + $0x30] sm:$0xff]  ;;  %v2623_v26 = vld [vmem:[%s3703_s6 + $0x28] sm:$0xff] }
  0x7f   :  { %v2587_v28 = vsel %vm62_vm3, 1.0, %v3053_v27  ;;  %v2586_v29 = vsel %vm61_vm4, 1.0, %v3053_v27 }
  0x80   :  { %2774 = vmatprep.mubr.msk.f32.mxu1 %vm175_vm2, %v2586_v29 }
  0x81   :  { %v74_v30 = vpop.permute.xlu1 %73  ;;  %v71_v31 = vpop.permute.xlu0 %70  ;;  %2775 = vmatmul.mubr.msk.f32.vlgmr.msra.gmra.mxu1 %vm175_vm2, %v2587_v28  ;;  %v2622_v28 = vld [vmem:[%s3703_s6 + $0x20] sm:$0xff] }
  0x82   :  { %vm76_vm6 = vcmp.eq.s32.totalorder %v74_v30, %v3197_v24  ;;  %vm75_vm7 = vcmp.eq.s32.totalorder %v71_v31, %v3197_v24  ;;  %2811 = vmatpush3.msra.mxu1 %v2625_v23 }
  0x83   :  { %v2589_v33 = vsel %vm76_vm6, 1.0, %v3053_v27  ;;  %v2588_v34 = vsel %vm75_vm7, 1.0, %v3053_v27  ;;  %2812 = vmatprep.subr.mxu1 %v2624_v25  ;;  %vm697_vm7 = vcmask 130048  }
  0x84   :  { %2757 = vmatprep.mubr.msk.f32.mxu0 %vm89_vm5, %v2588_v34  ;;  %2813 = vmatpush3.msra.mxu1 %v2624_v25 }
  0x85   :  { %v397_v35 = vpop.permute.xlu1 %396  ;;  %v394_v36 = vpop.permute.xlu0 %393  ;;  %2758 = vmatmul.mubr.msk.f32.vlgmr.msra.gmra.mxu0 %vm89_vm5, %v2589_v33  ;;  %2814 = vmatprep.subr.mxu1 %v2623_v26 }
  0x86   :  { %2778 = vmatpush3.msra.mxu0 %v264_v52  ;;  %vm398_vm3 = vcmp.eq.s32.totalorder %v394_v36, %v3197_v24  ;;  %vm399_vm4 = vcmp.eq.s32.totalorder %v397_v35, %v3197_v24  ;;  %2815 = vmatpush3.msra.mxu1 %v2623_v26  ;;  %v3371_v52 = vld [vmem:[%s3706_s9 + $0x8] sm:$0xff] }
  0x87   :  { %2779 = vmatprep.subr.mxu0 %v263_v53  ;;  %v2606_v0 = vsel %vm398_vm3, 1.0, %v3053_v27  ;;  %v2607_v1 = vsel %vm399_vm4, 1.0, %v3053_v27  ;;  %2816 = vmatprep.subr.mxu1 %v2622_v28 }
  0x88   :  { %2780 = vmatpush3.msra.mxu0 %v263_v53  ;;  %2817 = vmatpush3.msra.mxu1 %v2622_v28  ;;  %v3378_v53 = vld [vmem:[%s3706_s9] sm:$0xff]  ;;  %v3418_v28 = vld [vmem:[%s3706_s9 + $0x38] sm:$0xff] }
  0x89   :  { %v3214_v38 = vpop.permute.xlu1 %381  ;;  %v379_v39 = vpop.permute.xlu0 %378  ;;  %2781 = vmatprep.subr.mxu0 %v262_v54  ;;  %2821 = vmatprep.subr.mxu1 %v3053_v27 }
  0x8a   :  { %2782 = vmatpush3.msra.mxu0 %v262_v54  ;;  %vm383_vm6 = vcmp.eq.s32.totalorder %v379_v39, %v3197_v24  ;;  %v2596_v39 = vld [vmem:[%s3704_s7] ss:$0 sm:$0xff] }
  0x8b   :  { %2783 = vmatprep.subr.mxu0 %v261_v55  ;;  %v2602_v3 = vsel %vm383_vm6, 1.0, %v3053_v27 }
  0x8c   :  { %2784 = vmatpush3.msra.mxu0 %v261_v55 }
  0x8d   :  { %v370_v41 = vpop.permute.xlu1 %369  ;;  %v693_v42 = vpop.permute.xlu0 %692  ;;  %2788 = vmatprep.subr.msk.mxu0 %vm96_vm1, %v2615_v56 }
  0x8e   :  { %2976 = vrcp.f32 %v370_v41 }
  0x8f   :  { %2978 = vrcp.f32 %v693_v42 }
  0x91   :  { %v361_v44 = vpop.permute.xlu1 %360  ;;  %v684_v45 = vpop.permute.xlu0 %683 }
  0x92   :  { %vm363_vm11 = vcmp.lt.f32.partialorder %v48_v43, %v361_v44  ;;  %vm686_vm12 = vcmp.lt.f32.partialorder %v48_v43, %v684_v45 }
  0x93   :  { %vm364_vm13 = vmand %vm51_vm10, %vm363_vm11  ;;  %vm1054_vm11 = vcmask 64512  }
  0x94   :  { %vm687_vm14 = vmand %vm51_vm10, %vm686_vm12  ;;  %v2599_v47 = vsel %vm364_vm13, 1.0, %v3053_v27  ;;  %vm1042_vm10 = vcmask 63488  }
  0x95   :  { %v2631_v50 = vsel %vm687_vm14, 1.0, %v3053_v27  ;;  %v849_v10 = vpop.permute.xlu0 %848  ;;  %v852_v19 = vpop.permute.xlu1 %851  ;;  %vm2539_vm14 = vcmask 58368  }
  0x9b   :  { %v2977_v46 = vpop.eup %2976 }
  0x9c   :  { %v2979_v48 = vpop.eup %2978  ;;  %v3218_v49 = vmul.f32 %v2977_v46, %v2599_v47 }
  0x9d   :  { %v3221_v51 = vmul.f32 %v2979_v48, %v2631_v50 }
 0x141   :  { %v2776_v57 = vpop.f32.mrf.mxu1 }
 0x143   :  { %v252_v59 = vpop.f32.mrf.mxu1 }
 0x145   :  { %v2759_v58 = vpop.f32.mrf.mxu0 }
 0x146   :  { %v258_v62 = vadd.f32 %v2776_v57, %v2759_v58  ;;  %v3383_v57 = vsub.s32 0, %v3207_v32 }
 0x147   :  { %v166_v60 = vpop.f32.mrf.mxu0 }
 0x148   :  { %v253_v61 = vadd.f32 %v252_v59, %v166_v60  ;;  %v1528_v59 = vsub.s32 1, %v3207_v32 }
 0x14a   :  { %2785 = vmatprep.mubr.msk.f32.mxu0 %vm272_vm15, %v253_v61 }
 0x14b   :  { %2786 = vmatmul.mubr.msk.f32.vlgmr.msra.gmra.mxu0 %vm272_vm15, %v258_v62 }
 0x14c   :  { %2789 = vmatpush3.msk.msra.mxu0 %vm96_vm1, %v2615_v56  ;;  %2790 = vmatprep.mubr.msk.f32.mxu0 %vm89_vm5, %v2606_v0  ;;  %vm384_vm1 = vcmp.eq.s32.totalorder %v3214_v38, %v3197_v24  ;;  %v2627_v38 = vld [vmem:[%s3704_s7 + $0x1] ss:$0 sm:$0xff]  ;;  %s3056_s7 = smov [#allocation4]  }
 0x14d   :  { %2793 = vmatprep.subr.msk.mxu0 %vm182_vm0, %v2614_v63  ;;  %v2603_v13 = vsel %vm384_vm1, 1.0, %v3053_v27  ;;  %s2571_s21 = sshll.u32 %s3056_s7, 4  ;;  %s2572_s21 = int_to_ptr.vmem [resolvable:$true] %s2571_s21 }
 0x14e   :  { %s3008_s22 = scalar_lea.vmem %s2572_s21, 448  ;;  %p3013_p1 = scmp.lt.s32.totalorder %s2572_s21, %s2572_s21 }
 0x14f   :  { %2791 = vmatmul.mubr.msk.f32.vlgmr.msra.gmra.mxu0 %vm89_vm5, %v2607_v1  ;;  %vm853_vm5 = vcmp.eq.s32.totalorder %v849_v10, %v3197_v24  ;;  %p3009_p0 = scmp.ne.s32.totalorder %s2572_s21, %s3008_s22  ;;  %p3014_p2 = scmp.lt.s32.totalorder %s3008_s22, %s3008_s22 }
 0x150   :  { %2794 = vmatpush3.msk.msra.mxu0 %vm182_vm0, %v2614_v63  ;;  %2807 = vmatprep.mubr.msk.f32.mxu0 %vm175_vm2, %v2602_v3  ;;  %v2634_v15 = vsel %vm853_vm5, 1.0, %v3053_v27 }
 0x151   :  { %2795 = vmatprep.subr.mxu0 %v2613_v2  ;;  %p3015_p3 = por %p3014_p2, %p3013_p1 }
 0x152   :  { %2796 = vmatpush3.msra.mxu0 %v2613_v2 }
 0x153   :  { %2797 = vmatprep.subr.mxu0 %v2612_v4  ;;  %p3016_p4 = pnand %p3015_p3, %p3009_p0 }
 0x154   :  { %2798 = vmatpush3.msra.mxu0 %v2612_v4 }
 0x155   :  { %2799 = vmatprep.subr.mxu0 %v2611_v5 }
 0x156   :  { %2800 = vmatpush3.msra.mxu0 %v2611_v5 }
 0x157   :  { %2801 = vmatprep.subr.mxu0 %v2610_v7 }
 0x158   :  { %2802 = vmatpush3.msra.mxu0 %v2610_v7 }
 0x159   :  { %2803 = vmatprep.subr.mxu0 %v2609_v9 }
 0x15a   :  { %2804 = vmatpush3.msra.mxu0 %v2609_v9 }
 0x15b   :  { %2805 = vmatprep.subr.mxu0 %v2608_v11 }
 0x15c   :  { %2806 = vmatpush3.msra.mxu0 %v2608_v11  ;;  %v3406_v11 = vcvt.s32.f32 %v3197_v24 }
 0x15d   :  { %2808 = vmatmul.mubr.msk.f32.vlgmr.msra.gmra.mxu0 %vm175_vm2, %v2603_v13  ;;  %2835 = vmatprep.subr.msk.mxu0 %vm182_vm0, %v865_v12 }
 0x15e   :  { %2836 = vmatpush3.msk.msra.mxu0 %vm182_vm0, %v865_v12  ;;  %2849 = vmatprep.mubr.msk.f32.mxu0 %vm175_vm2, %v2634_v15  ;;  %vm854_vm0 = vcmp.eq.s32.totalorder %v852_v19, %v3197_v24  ;;  %v962_v12 = vstv %s2959_s27 }
 0x15f   :  { %2837 = vmatprep.subr.mxu0 %v864_v14  ;;  %v2635_v22 = vsel %vm854_vm0, 1.0, %v3053_v27  ;;  %vm964_vm9 = vcmp.lt.f32.partialorder %v3406_v11, %v962_v12 }
 0x160   :  { %2838 = vmatpush3.msra.mxu0 %v864_v14 }
 0x161   :  { %2839 = vmatprep.subr.mxu0 %v863_v16 }
 0x162   :  { %2840 = vmatpush3.msra.mxu0 %v863_v16 }
 0x163   :  { %2841 = vmatprep.subr.mxu0 %v862_v17 }
 0x164   :  { %2842 = vmatpush3.msra.mxu0 %v862_v17 }
 0x165   :  { %2843 = vmatprep.subr.mxu0 %v861_v18 }
 0x166   :  { %2844 = vmatpush3.msra.mxu0 %v861_v18 }
 0x167   :  { %2845 = vmatprep.subr.mxu0 %v860_v20 }
 0x168   :  { %2846 = vmatpush3.msra.mxu0 %v860_v20 }
 0x169   :  { %2847 = vmatprep.subr.mxu0 %v859_v21 }
 0x16a   :  { %2848 = vmatpush3.msra.mxu0 %v859_v21 }
 0x16b   :  { %2850 = vmatmul.mubr.msk.f32.vlgmr.msra.gmra.mxu0 %vm175_vm2, %v2635_v22  ;;  %2873 = vmatprep.subr.mxu0 %v3053_v27  ;;  %vm3054_vm2 = vmmov 0  }
 0x16c   :  { %2881 = vmatprep.mubr.msk.f32.mxu0 %vm3054_vm2, %v3053_v27 }
 0x20b   :  { %v2787_v29 = vpop.f32.mrf.mxu0 }
 0x20c   :  { %v351_v43 = vadd.f32 %v2787_v29, %v2596_v39  ;;  %v3425_v29 = vld [vmem:[%s3706_s9 + $0x30] sm:$0xff] }
 0x20d   :  { %v345_v30 = vpop.f32.mrf.mxu0 }
 0x20e   :  { %v346_v45 = vadd.f32 %v2596_v39, %v345_v30  ;;  %v3434_v30 = vld [vmem:[%s3706_s9 + $0x28] sm:$0xff] }
 0x20f   :  { %v2792_v31 = vpop.f32.mrf.mxu0 }
 0x211   :  { %v489_v33 = vpop.f32.mrf.mxu0 }
 0x21d   :  { %v2809_v34 = vpop.f32.mrf.mxu0 }
 0x21e   :  { %v579_v37 = vadd.f32 %v2809_v34, %v2792_v31  ;;  %v3441_v31 = vld [vmem:[%s3706_s9 + $0x20] sm:$0xff] }
 0x21f   :  { %v573_v35 = vpop.f32.mrf.mxu0 }
 0x220   :  { %v574_v36 = vadd.f32 %v573_v35, %v489_v33  ;;  %v1279_v35 = vstv %s2961_s16 }
 0x221   :  { %vm1281_vm12 = vcmp.lt.f32.partialorder %v3406_v11, %v1279_v35 }
 0x222   :  { %2818 = vmatprep.mubr.msk.f32.mxu1 %vm272_vm15, %v574_v36 }
 0x223   :  { %2819 = vmatmul.mubr.msk.f32.vlgmr.msra.gmra.mxu1 %vm272_vm15, %v579_v37 }
 0x224   :  { %2825 = vmatprep.mubr.msk.f32.mxu1 %vm3054_vm2, %v3053_v27 }
 0x22b   :  { %v2851_v60 = vpop.f32.mrf.mxu0 }
 0x22d   :  { %v941_v1 = vpop.f32.mrf.mxu0 }
 0x2e3   :  { %v2820_v40 = vpop.f32.mrf.mxu1 }
 0x2e4   :  { %v673_v41 = vadd.f32 %v2820_v40, %v2627_v38 }
 0x2e5   :  { %v667_v42 = vpop.f32.mrf.mxu1 }
 0x2e6   :  { %2980 = vtanh.f32 %v673_v41  ;;  %v668_v44 = vadd.f32 %v2627_v38, %v667_v42 }
 0x2e8   :  { %2982 = vtanh.f32 %v668_v44 }
 0x2e9   :  { %2984 = vtanh.f32 %v351_v43 }
 0x2ea   :  { %2986 = vtanh.f32 %v346_v45 }
 0x2f3   :  { %v3333_v46 = vpop.eup %2980 }
 0x2f4   :  { %2822 = vmatpush3.msra.mxu1 %v3333_v46 }
 0x2f5   :  { %v3336_v47 = vpop.eup %2982  ;;  %2823 = vmatprep.subr.mxu1 %v3053_v27 }
 0x2f6   :  { %2824 = vmatpush3.msra.mxu1 %v3336_v47  ;;  %v3340_v48 = vpop.eup %2984 }
 0x2f7   :  { %2826 = vmatmul.mubr.msk.f32.vlgmr.msra.gmra.mxu1 %vm697_vm7, %v3221_v51  ;;  %2828 = vmatprep.subr.mxu1 %v3053_v27  ;;  %v2987_v50 = vpop.eup %2986  ;;  %v3357_v51 = vld [vmem:[%s3706_s9 + $0x18] sm:$0xff] }
 0x2f8   :  { %2829 = vmatpush3.msra.mxu1 %v3340_v48  ;;  %2832 = vmatprep.mubr.msk.f32.mxu1 %vm3054_vm2, %v3053_v27 }
 0x2f9   :  { %2830 = vmatprep.subr.mxu1 %v3053_v27  ;;  %2874 = vmatpush3.msra.mxu0 %v3357_v51 }
 0x2fa   :  { %2831 = vmatpush3.msra.mxu1 %v2987_v50  ;;  %2875 = vmatprep.subr.mxu0 %v3053_v27 }
 0x2fb   :  { %2833 = vmatmul.mubr.msk.f32.vlgmr.msra.gmra.mxu1 %vm697_vm7, %v3218_v49  ;;  %2852 = vmatprep.subr.mxu1 %v3053_v27  ;;  %v3364_v49 = vld [vmem:[%s3706_s9 + $0x10] sm:$0xff] }
 0x2fc   :  { %2853 = vmatpush3.xpose.msk.msra.mxu1 %vm272_vm15, %v2987_v50  ;;  %2854 = vmatprep.mubr.msk.f32.mxu1 %vm3054_vm2, %v3053_v27 }
 0x2fd   :  { %2857 = vmatprep.subr.mxu1 %v3053_v27  ;;  %2876 = vmatpush3.msra.mxu0 %v3364_v49 }
 0x2fe   :  { %2877 = vmatprep.subr.mxu0 %v3053_v27 }
 0x2ff   :  { %2878 = vmatpush3.msra.mxu0 %v3371_v52 }
 0x300   :  { %2879 = vmatprep.subr.mxu0 %v3053_v27 }
 0x301   :  { %2880 = vmatpush3.msra.mxu0 %v3378_v53 }
 0x302   :  { %2889 = vmatprep.subr.mxu0 %v3053_v27 }
 0x3b7   :  { %v767_v54 = vpop.f32.mrf.mxu1 }
 0x3b9   :  { %v2827_v55 = vpop.f32.mrf.mxu1 }
 0x3ba   :  { %v3470_v55 = vld [vmem:[%s3706_s9 + $0x50] sm:$0xff] }
 0x3bb   :  { %v840_v56 = vpop.f32.mrf.mxu1 }
 0x3bc   :  { %v841_v58 = vadd.f32 %v840_v56, %v767_v54  ;;  %v3465_v54 = vld [vmem:[%s3706_s9 + $0x58] sm:$0xff]  ;;  %v3477_v56 = vld [vmem:[%s3706_s9 + $0x48] sm:$0xff] }
 0x3bd   :  { %v2834_v61 = vpop.f32.mrf.mxu1 }
 0x3be   :  { %v844_v62 = vmul.f32 0.5, %v841_v58 }
 0x3c0   :  { %v954_v63 = vrot.slane %v844_v62, %v3383_v57  ;;  %v1529_v0 = vrot.slane %v844_v62, %v1528_v59 }
 0x3c2   :  { %v955_v2 = vadd.f32 %v954_v63, %v941_v1  ;;  %v3387_v3 = vadd.f32 %v1529_v0, %v941_v1  ;;  %v3389_v4 = vadd.f32 %v2851_v60, %v1529_v0  ;;  %v3506_v1 = vld [vmem:[%s3706_s9 + $0x40] sm:$0xff] }
 0x3c4   :  { %v956_v5 = vmul.f32 0.17677669, %v955_v2  ;;  %2882 = vmatmul.mubr.msk.f32.vlgmr.msra.gmra.mxu0 %vm272_vm15, %v955_v2  ;;  %v1780_v7 = vrot.slane %v3387_v3, 7  ;;  %v1781_v9 = vrot.slane %v3389_v4, 7  ;;  %v1532_v58 = vmul.f32 0.17677669, %v3387_v3 }
 0x3c5   :  { %2890 = vmatpush3.msra.mxu0 %v3336_v47  ;;  %2891 = vmatprep.mubr.msk.f32.mxu0 %vm3054_vm2, %v3053_v27  ;;  %v1533_v59 = vmul.f32 0.17677669, %v3389_v4 }
 0x3c6   :  { %2855 = vmatmul.mubr.msk.f32.vlgmr.msra.gmra.mxu1 %vm272_vm15, %v956_v5  ;;  %2905 = vmatprep.subr.mxu0 %v3053_v27  ;;  %v3402_v10 = vsel %vm1541_vm8, %v1780_v7, %v1781_v9  ;;  %v1542_v62 = vrot.slane %v1532_v58, 7 }
 0x3c7   :  { %2858 = vmatpush3.msra.mxu1 %v2987_v50  ;;  %2859 = vmatprep.mubr.msk.f32.mxu1 %vm3054_vm2, %v3053_v27  ;;  %v1534_v50 = vrot.slane %v3140_v6, 1  ;;  %v1543_v63 = vrot.slane %v1533_v59, 7 }
 0x3c8   :  { %2862 = vmatprep.subr.mxu1 %v3053_v27 }
 0x3c9   :  { %2962 = vpush %v1534_v50  ;;  %v3495_v0 = vsel %vm1541_vm8, %v1542_v62, %v1543_v63 }
 0x3fa   :  { %s2963_s2 = spop %2962 }
 0x3fb   :  { %v1536_v2 = vstv %s2963_s2 }
 0x3fc   :  { %vm1538_vm13 = vcmp.lt.f32.partialorder %v3406_v11, %v1536_v2 }
 0x484   :  { %v3408_v13 = vpop.f32.mrf.mxu0 }
 0x486   :  { %v1037_v14 = vpop.f32.mrf.mxu1  ;;  %v2883_v15 = vpop.f32.mrf.mxu0 }
 0x487   :  { %v1041_v16 = vsel %vm964_vm9, %v1037_v14, -1e+30 }
 0x488   :  { %v2856_v17 = vpop.f32.mrf.mxu1  ;;  %v1043_v18 = vsel %vm1042_vm10, %v1041_v16, -inf }
 0x489   :  { %1044 = vmax.xlane.f32.xlu0 %v1043_v18 }
 0x512   :  { %v1045_v19 = vpop.xlane.xlu0 %1044 }
 0x513   :  { %v1046_v20 = vsub.f32 %v1041_v16, %v1045_v19 }
 0x515   :  { %v1047_v21 = vmul.f32 1.442695, %v1046_v20 }
 0x517   :  { %2988 = vpow2.f32 %v1047_v21 }
 0x524   :  { %v2989_v22 = vpop.eup %2988 }
 0x525   :  { %v1049_v24 = vsel %vm1042_vm10, %v2989_v22, 0.0 }
 0x526   :  { %1050 = vadd.xlane.f32.xlu1 %v1049_v24 }
 0x5af   :  { %v1051_v23 = vpop.xlane.xlu1 %1050 }
 0x5b0   :  { %2990 = vrcp.f32 %v1051_v23 }
 0x5bd   :  { %v2991_v25 = vpop.eup %2990 }
 0x5be   :  { %v3413_v26 = vmul.f32 %v2991_v25, %v2989_v22  ;;  %v3055_v22 = vmov 1966171168  }
 0x5bf   :  { %v2097_v24 = vunpack.c.l.s4 %v3055_v22 }
 0x5c0   :  { %2860 = vmatmul.mubr.msk.f32.vlgmr.msra.gmra.mxu1 %vm1054_vm11, %v3413_v26 }
 0x5c1   :  { %2863 = vmatpush3.msra.mxu1 %v3418_v28  ;;  %2870 = vmatprep.mubr.msk.f32.mxu1 %vm3054_vm2, %v3053_v27  ;;  %v2098_v25 = vunpack.c.0.s8 %v2097_v24 }
 0x5c2   :  { %2864 = vmatprep.subr.mxu1 %v3053_v27 }
 0x5c3   :  { %2865 = vmatpush3.msra.mxu1 %v3425_v29 }
 0x5c4   :  { %2866 = vmatprep.subr.mxu1 %v3053_v27 }
 0x5c5   :  { %2867 = vmatpush3.msra.mxu1 %v3434_v30 }
 0x5c6   :  { %2868 = vmatprep.subr.mxu1 %v3053_v27 }
 0x5c7   :  { %2869 = vmatpush3.msra.mxu1 %v3441_v31 }
 0x5c8   :  { %2884 = vmatprep.subr.mxu1 %v3053_v27 }
 0x680   :  { %v1124_v33 = vpop.f32.mrf.mxu1 }
 0x681   :  { %2871 = vmatmul.mubr.msk.f32.vlgmr.msra.gmra.mxu1 %vm272_vm15, %v1124_v33 }
 0x682   :  { %2885 = vmatpush3.xpose.msk.msra.mxu1 %vm272_vm15, %v3336_v47  ;;  %v2861_v34 = vpop.f32.mrf.mxu1  ;;  %2886 = vmatprep.mubr.msk.f32.mxu1 %vm3054_vm2, %v3053_v27 }
 0x683   :  { %2894 = vmatprep.subr.mxu1 %v3053_v27 }
 0x685   :  { %2887 = vmatmul.mubr.msk.f32.vlgmr.msra.gmra.mxu1 %vm272_vm15, %v956_v5 }
 0x686   :  { %2902 = vmatprep.mubr.msk.f32.mxu1 %vm3054_vm2, %v3053_v27  ;;  %2895 = vmatpush3.msra.mxu1 %v3465_v54 }
 0x687   :  { %2896 = vmatprep.subr.mxu1 %v3053_v27 }
 0x688   :  { %2897 = vmatpush3.msra.mxu1 %v3470_v55 }
 0x689   :  { %2898 = vmatprep.subr.mxu1 %v3053_v27 }
 0x68a   :  { %2899 = vmatpush3.msra.mxu1 %v3477_v56 }
 0x68b   :  { %2900 = vmatprep.subr.mxu1 %v3053_v27 }
 0x68c   :  { %2901 = vmatpush3.msra.mxu1 %v3506_v1 }
 0x68d   :  { %2915 = vmatprep.subr.mxu1 %v3053_v27 }
 0x741   :  { %v3456_v36 = vpop.f32.mrf.mxu1 }
 0x742   :  { %v1275_v18 = vadd.f32 %v3408_v13, %v3456_v36 }
 0x743   :  { %v2872_v37 = vpop.f32.mrf.mxu1 }
 0x745   :  { %v1351_v38 = vpop.f32.mrf.mxu1 }
 0x746   :  { %v1355_v39 = vsel %vm1281_vm12, %v1351_v38, -1e+30 }
 0x747   :  { %v2888_v40 = vpop.f32.mrf.mxu1  ;;  %v1356_v41 = vsel %vm1042_vm10, %v1355_v39, -inf }
 0x748   :  { %1357 = vmax.xlane.f32.xlu0 %v1356_v41 }
 0x7d1   :  { %v1358_v42 = vpop.xlane.xlu0 %1357 }
 0x7d2   :  { %v1359_v43 = vsub.f32 %v1355_v39, %v1358_v42 }
 0x7d4   :  { %v1360_v44 = vmul.f32 1.442695, %v1359_v43 }
 0x7d6   :  { %2992 = vpow2.f32 %v1360_v44 }
 0x7e3   :  { %v2993_v45 = vpop.eup %2992 }
 0x7e4   :  { %v1362_v47 = vsel %vm1042_vm10, %v2993_v45, 0.0 }
 0x7e5   :  { %1363 = vadd.xlane.f32.xlu0 %v1362_v47 }
 0x86e   :  { %v1364_v6 = vpop.xlane.xlu0 %1363 }
 0x86f   :  { %2994 = vrcp.f32 %v1364_v6 }
 0x87c   :  { %v2995_v60 = vpop.eup %2994 }
 0x87d   :  { %v3485_v61 = vmul.f32 %v2995_v60, %v2993_v45 }
 0x87f   :  { %2892 = vmatmul.mubr.msk.f32.vlgmr.msra.gmra.mxu0 %vm1054_vm11, %v3485_v61 }
 0x880   :  { %2906 = vmatpush3.xpose.msk.msra.mxu0 %vm272_vm15, %v3340_v48  ;;  %2907 = vmatprep.mubr.msk.f32.mxu0 %vm3054_vm2, %v3053_v27 }
 0x881   :  { %2910 = vmatprep.subr.mxu0 %v3053_v27 }
 0x883   :  { %2908 = vmatmul.mubr.msk.f32.vlgmr.msra.gmra.mxu0 %vm272_vm15, %v3495_v0 }
 0x884   :  { %2911 = vmatpush3.msra.mxu0 %v3340_v48  ;;  %2912 = vmatprep.mubr.msk.f32.mxu0 %vm3054_vm2, %v3053_v27 }
 0x885   :  { %2926 = vmatprep.subr.mxu0 %v3053_v27 }
 0x93f   :  { %v1436_v3 = vpop.f32.mrf.mxu0 }
 0x940   :  { %2903 = vmatmul.mubr.msk.f32.vlgmr.msra.gmra.mxu1 %vm272_vm15, %v1436_v3 }
 0x941   :  { %v2893_v48 = vpop.f32.mrf.mxu0  ;;  %2916 = vmatpush3.msra.mxu1 %v3418_v28  ;;  %2923 = vmatprep.mubr.msk.f32.mxu1 %vm3054_vm2, %v3053_v27  ;;  %v3529_v28 = vsub.s32 %v2098_v25, %v3207_v32  ;;  %v2394_v25 = vcombine.high %v3485_v61, %v3485_v61 }
 0x942   :  { %2917 = vmatprep.subr.mxu1 %v3053_v27 }
 0x943   :  { %v1616_v4 = vpop.f32.mrf.mxu0  ;;  %2918 = vmatpush3.msra.mxu1 %v3425_v29  ;;  %v2249_v29 = vcombine.high %v3413_v26, %v3413_v26 }
 0x944   :  { %v1620_v5 = vsel %vm1538_vm13, %v1616_v4, -1e+30  ;;  %2919 = vmatprep.subr.mxu1 %v3053_v27 }
 0x945   :  { %v2909_v7 = vpop.f32.mrf.mxu0  ;;  %v1621_v9 = vsel %vm1042_vm10, %v1620_v5, -inf  ;;  %2920 = vmatpush3.msra.mxu1 %v3434_v30  ;;  %v2256_v30 = vrot.slane %v3413_v26, %v3529_v28  ;;  %v2263_v13 = vrot.slane %v2249_v29, %v3529_v28 }
 0x946   :  { %1622 = vmax.xlane.f32.xlu1 %v1621_v9  ;;  %2921 = vmatprep.subr.mxu1 %v3053_v27 }
 0x947   :  { %2922 = vmatpush3.msra.mxu1 %v3441_v31  ;;  %v2264_v34 = vcombine.high %v2256_v30, %v2256_v30  ;;  %v2272_v35 = vrot.slane %v2256_v30, %v3529_v28  ;;  %v2265_v32 = vcombine.high %v2263_v13, %v2263_v13  ;;  %v2279_v38 = vrot.slane %v2263_v13, %v3529_v28 }
 0x948   :  { %2937 = vmatprep.subr.mxu1 %v3053_v27  ;;  %v2408_v30 = vrot.slane %v2394_v25, %v3529_v28 }
 0x949   :  { %v2286_v41 = vrot.slane %v2264_v34, %v3529_v28  ;;  %v2294_v42 = vcombine.high %v2272_v35, %v2272_v35  ;;  %v2293_v47 = vrot.slane %v2265_v32, %v3529_v28  ;;  %v2295_v50 = vcombine.high %v2279_v38, %v2279_v38 }
 0x94b   :  { %v2296_v62 = vcombine.high %v2286_v41, %v2286_v41 }
 0x9cf   :  { %v1623_v12 = vpop.xlane.xlu1 %1622 }
 0x9d0   :  { %v1624_v14 = vsub.f32 %v1620_v5, %v1623_v12 }
 0x9d2   :  { %v1625_v15 = vmul.f32 1.442695, %v1624_v14 }
 0x9d4   :  { %2996 = vpow2.f32 %v1625_v15 }
 0x9e1   :  { %v2997_v16 = vpop.eup %2996 }
 0x9e2   :  { %v1627_v17 = vsel %vm1042_vm10, %v2997_v16, 0.0 }
 0x9e3   :  { %1628 = vadd.xlane.f32.xlu0 %v1627_v17 }
 0xa00   :  { %v1513_v19 = vpop.f32.mrf.mxu1 }
 0xa01   :  { %v3526_v20 = vadd.f32 %v1513_v19, %v1275_v18 }
 0xa02   :  { %v2904_v21 = vpop.f32.mrf.mxu1 }
 0xa6c   :  { %v1629_v23 = vpop.xlane.xlu0 %1628 }
 0xa6d   :  { %2998 = vrcp.f32 %v1629_v23 }
 0xa7a   :  { %v2999_v31 = vpop.eup %2998 }
 0xa7b   :  { %v1631_v33 = vmul.f32 %v2999_v31, %v2997_v16 }
 0xa7d   :  { %2913 = vmatmul.mubr.msk.f32.vlgmr.msra.gmra.mxu0 %vm1054_vm11, %v1631_v33  ;;  %v2304_v36 = vcombine.high %v1631_v33, %v1631_v33  ;;  %v2311_v37 = vrot.slane %v1631_v33, %v3529_v28 }
 0xa7e   :  { %2927 = vmatpush3.msra.mxu0 %v3357_v51  ;;  %2934 = vmatprep.mubr.msk.f32.mxu0 %vm3054_vm2, %v3053_v27 }
 0xa7f   :  { %v2318_v26 = vrot.slane %v2304_v36, %v3529_v28  ;;  %v2319_v39 = vcombine.high %v2311_v37, %v2311_v37  ;;  %v2327_v40 = vrot.slane %v2311_v37, %v3529_v28  ;;  %2928 = vmatprep.subr.mxu0 %v3053_v27  ;;  %v2424_v37 = vrot.slane %v2408_v30, %v3529_v28 }
 0xa80   :  { %2929 = vmatpush3.msra.mxu0 %v3364_v49 }
 0xa81   :  { %v2320_v43 = vcombine.high %v2318_v26, %v2318_v26  ;;  %v2334_v44 = vrot.slane %v2318_v26, %v3529_v28  ;;  %v2341_v51 = vrot.slane %v2319_v39, %v3529_v28  ;;  %v2349_v45 = vcombine.high %v2327_v40, %v2327_v40  ;;  %2930 = vmatprep.subr.mxu0 %v3053_v27 }
 0xa82   :  { %v2355_v6 = vrot.slane %v2327_v40, %v3383_v57  ;;  %2931 = vmatpush3.msra.mxu0 %v3371_v52 }
 0xa83   :  { %v2348_v58 = vrot.slane %v2320_v43, %v3529_v28  ;;  %v2350_v59 = vcombine.high %v2334_v44, %v2334_v44  ;;  %v2351_v49 = vcombine.high %v2341_v51, %v2341_v51  ;;  %v2359_v60 = vrot.slane %v2341_v51, %v3383_v57  ;;  %2932 = vmatprep.subr.mxu0 %v3053_v27 }
 0xa84   :  { %v2363_v63 = vrot.slane %v2349_v45, %v3383_v57  ;;  %v2371_v2 = vrot.slane %v2334_v44, %v3383_v57  ;;  %v2387_v3 = vsel %vm1541_vm8, %v2272_v35, %v2355_v6  ;;  %2933 = vmatpush3.msra.mxu0 %v3378_v53  ;;  %v2410_v35 = vcombine.high %v2408_v30, %v2408_v30 }
 0xa85   :  { %v2367_v48 = vrot.slane %v2351_v49, %v3383_v57  ;;  %v2375_v52 = vrot.slane %v2348_v58, %v3383_v57  ;;  %v2379_v4 = vrot.slane %v2350_v59, %v3383_v57  ;;  %v2388_v5 = vsel %vm1541_vm8, %v2286_v41, %v2359_v60  ;;  %2540 = vst.msk [vmem:[#allocation4] sm:$0x3] %vm2539_vm14, %v2387_v3 }
 0xa86   :  { %2935 = vmatmul.mubr.msk.f32.vlgmr.msra.gmra.mxu0 %vm272_vm15, %v3402_v10  ;;  %v2389_v7 = vsel %vm1541_vm8, %v2294_v42, %v2363_v63  ;;  %v2391_v9 = vsel %vm1541_vm8, %v2279_v38, %v2371_v2  ;;  %2541 = vst.msk [vmem:[#allocation4 + $0x2] sm:$0x3] %vm2539_vm14, %v2388_v5  ;;  %2942 = vmatprep.subr.mxu0 %v3053_v27  ;;  %v1855_v10 = vrot.slane %v3145_v8, 1 }
 0xa87   :  { %2944 = vmatprep.mubr.msk.f32.mxu0 %vm3054_vm2, %v3053_v27  ;;  %v2390_v53 = vsel %vm1541_vm8, %v2296_v62, %v2367_v48  ;;  %v2392_v12 = vsel %vm1541_vm8, %v2293_v47, %v2375_v52  ;;  %v2393_v14 = vsel %vm1541_vm8, %v2295_v50, %v2379_v4  ;;  %2542 = vst.msk [vmem:[#allocation4 + $0x4] sm:$0x3] %vm2539_vm14, %v2389_v7  ;;  %2544 = vst.msk [vmem:[#allocation4 + $0x8] sm:$0x3] %vm2539_vm14, %v2391_v9 }
 0xa88   :  { %2943 = vmatpush3.msra.mxu0 %v3333_v46  ;;  %2543 = vst.msk [vmem:[#allocation4 + $0x6] sm:$0x3] %vm2539_vm14, %v2390_v53  ;;  %2545 = vst.msk [vmem:[#allocation4 + $0xa] sm:$0x3] %vm2539_vm14, %v2392_v12  ;;  %v2438_v43 = vrot.slane %v2410_v35, %v3529_v28  ;;  %v2440_v51 = vcombine.high %v2424_v37, %v2424_v37 }
 0xa89   :  { %2546 = vst.msk [vmem:[#allocation4 + $0xc] sm:$0x3] %vm2539_vm14, %v2393_v14 }
 0xa8a   :  { %2964 = vpush %v1855_v10 }
 0xabb   :  { %s2965_s9 = spop %2964 }
 0xb3d   :  { %v1701_v15 = vpop.f32.mrf.mxu0 }
 0xb3e   :  { %2924 = vmatmul.mubr.msk.f32.vlgmr.msra.gmra.mxu1 %vm272_vm15, %v1701_v15 }
 0xb3f   :  { %2938 = vmatpush3.xpose.msk.msra.mxu1 %vm272_vm15, %v3333_v46  ;;  %v2914_v16 = vpop.f32.mrf.mxu0  ;;  %2939 = vmatprep.mubr.msk.f32.mxu1 %vm3054_vm2, %v3053_v27 }
 0xb40   :  { %2947 = vmatprep.subr.mxu1 %v3053_v27 }
 0xb42   :  { %2940 = vmatmul.mubr.msk.f32.vlgmr.msra.gmra.mxu1 %vm272_vm15, %v3495_v0 }
 0xb43   :  { %2948 = vmatpush3.msra.mxu1 %v3465_v54  ;;  %2955 = vmatprep.mubr.msk.f32.mxu1 %vm3054_vm2, %v3053_v27  ;;  %v1857_v54 = vstv %s2965_s9 }
 0xb44   :  { %2949 = vmatprep.subr.mxu1 %v3053_v27  ;;  %vm1859_vm3 = vcmp.lt.f32.partialorder %v3406_v11, %v1857_v54  ;;  %v2401_v11 = vrot.slane %v3485_v61, %v3529_v28 }
 0xb45   :  { %2950 = vmatpush3.msra.mxu1 %v3470_v55 }
 0xb46   :  { %v3596_v8 = vpop.f32.mrf.mxu0  ;;  %2951 = vmatprep.subr.mxu1 %v3053_v27  ;;  %v2409_v13 = vcombine.high %v2401_v11, %v2401_v11  ;;  %v2417_v36 = vrot.slane %v2401_v11, %v3529_v28 }
 0xb47   :  { %2952 = vmatpush3.msra.mxu1 %v3477_v56 }
 0xb48   :  { %v2936_v46 = vpop.f32.mrf.mxu0  ;;  %2953 = vmatprep.subr.mxu1 %v3053_v27  ;;  %v2431_v26 = vrot.slane %v2409_v13, %v3529_v28  ;;  %v2439_v44 = vcombine.high %v2417_v36, %v2417_v36 }
 0xb49   :  { %2954 = vmatpush3.msra.mxu1 %v3506_v1 }
 0xb4a   :  { %v2441_v59 = vcombine.high %v2431_v26, %v2431_v26 }
 0xbfe   :  { %v3603_v0 = vpop.f32.mrf.mxu1 }
 0xc00   :  { %v2925_v17 = vpop.f32.mrf.mxu1 }
 0xc02   :  { %v1929_v18 = vpop.f32.mrf.mxu1 }
 0xc03   :  { %v1933_v19 = vsel %vm1859_vm3, %v1929_v18, -1e+30 }
 0xc04   :  { %v2941_v21 = vpop.f32.mrf.mxu1  ;;  %v1934_v55 = vsel %vm1042_vm10, %v1933_v19, -inf }
 0xc05   :  { %1935 = vmax.xlane.f32.xlu1 %v1934_v55 }
 0xc8e   :  { %v1936_v22 = vpop.xlane.xlu1 %1935 }
 0xc8f   :  { %v1937_v24 = vsub.f32 %v1933_v19, %v1936_v22 }
 0xc91   :  { %v1938_v56 = vmul.f32 1.442695, %v1937_v24 }
 0xc93   :  { %3000 = vpow2.f32 %v1938_v56 }
 0xca0   :  { %v3001_v27 = vpop.eup %3000 }
 0xca1   :  { %v1940_v1 = vsel %vm1042_vm10, %v3001_v27, 0.0 }
 0xca2   :  { %1941 = vadd.xlane.f32.xlu0 %v1940_v1 }
 0xd2b   :  { %v1942_v23 = vpop.xlane.xlu0 %1941 }
 0xd2c   :  { %3002 = vrcp.f32 %v1942_v23 }
 0xd39   :  { %v3003_v29 = vpop.eup %3002 }
 0xd3a   :  { %v1944_v31 = vmul.f32 %v3003_v29, %v3001_v27 }
 0xd3c   :  { %2945 = vmatmul.mubr.msk.f32.vlgmr.msra.gmra.mxu0 %vm1054_vm11, %v1944_v31  ;;  %v2449_v33 = vcombine.high %v1944_v31, %v1944_v31  ;;  %v2456_v34 = vrot.slane %v1944_v31, %v3529_v28 }
 0xd3e   :  { %v2463_v32 = vrot.slane %v2449_v33, %v3529_v28  ;;  %v2464_v38 = vcombine.high %v2456_v34, %v2456_v34  ;;  %v2472_v61 = vrot.slane %v2456_v34, %v3529_v28 }
 0xd40   :  { %v2465_v39 = vcombine.high %v2463_v32, %v2463_v32  ;;  %v2479_v40 = vrot.slane %v2463_v32, %v3529_v28  ;;  %v2486_v41 = vrot.slane %v2464_v38, %v3529_v28  ;;  %v2494_v42 = vcombine.high %v2472_v61, %v2472_v61 }
 0xd41   :  { %v2500_v45 = vrot.slane %v2472_v61, %v3383_v57 }
 0xd42   :  { %v2493_v47 = vrot.slane %v2465_v39, %v3529_v28  ;;  %v2495_v50 = vcombine.high %v2479_v40, %v2479_v40  ;;  %v2496_v6 = vcombine.high %v2486_v41, %v2486_v41  ;;  %v2504_v58 = vrot.slane %v2486_v41, %v3383_v57 }
 0xd43   :  { %v2508_v49 = vrot.slane %v2494_v42, %v3383_v57  ;;  %v2516_v60 = vrot.slane %v2479_v40, %v3383_v57  ;;  %v2532_v62 = vsel %vm1541_vm8, %v2417_v36, %v2500_v45 }
 0xd44   :  { %v2512_v63 = vrot.slane %v2496_v6, %v3383_v57  ;;  %v2520_v2 = vrot.slane %v2493_v47, %v3383_v57  ;;  %v2524_v3 = vrot.slane %v2495_v50, %v3383_v57  ;;  %v2533_v48 = vsel %vm1541_vm8, %v2431_v26, %v2504_v58  ;;  %2547 = vst.msk [vmem:[#allocation4 + $0xe] sm:$0x3] %vm2539_vm14, %v2532_v62 }
 0xd45   :  { %v2534_v52 = vsel %vm1541_vm8, %v2439_v44, %v2508_v49  ;;  %v2536_v4 = vsel %vm1541_vm8, %v2424_v37, %v2516_v60  ;;  %2548 = vst.msk [vmem:[#allocation4 + $0x10] sm:$0x3] %vm2539_vm14, %v2533_v48 }
 0xd46   :  { %v2535_v5 = vsel %vm1541_vm8, %v2441_v59, %v2512_v63  ;;  %v2537_v7 = vsel %vm1541_vm8, %v2438_v43, %v2520_v2  ;;  %v2538_v9 = vsel %vm1541_vm8, %v2440_v51, %v2524_v3  ;;  %2549 = vst.msk [vmem:[#allocation4 + $0x12] sm:$0x3] %vm2539_vm14, %v2534_v52  ;;  %2551 = vst.msk [vmem:[#allocation4 + $0x16] sm:$0x3] %vm2539_vm14, %v2536_v4 }
 0xd47   :  { %2550 = vst.msk [vmem:[#allocation4 + $0x14] sm:$0x3] %vm2539_vm14, %v2535_v5  ;;  %2552 = vst.msk [vmem:[#allocation4 + $0x18] sm:$0x3] %vm2539_vm14, %v2537_v7 }
 0xd48   :  { %2553 = vst.msk [vmem:[#allocation4 + $0x1a] sm:$0x3] %vm2539_vm14, %v2538_v9 }
 0xdfc   :  { %v2014_v53 = vpop.f32.mrf.mxu0 }
 0xdfd   :  { %2956 = vmatmul.mubr.msk.f32.vlgmr.msra.gmra.mxu1 %vm272_vm15, %v2014_v53 }
 0xdfe   :  { %v2946_v12 = vpop.f32.mrf.mxu0 }
 0xdff   :  { %3019 = shalt.err (!%p3016_p4)
}
 0xe00   :  { %s3057_s23 = smov 32   ;;  %s3058_s24 = smov 2   ;;  %v2648_v14 = vld [vmem:[%s3707_s10] ss:$0 sm:$0xff]  ;;  %v1852_v15 = vadd.f32 %v3596_v8, %v3603_v0  ;;  %vm2241_vm15 = vcmask 254976  }
 0xe01   :  { %2577 = dma.vmem_to_hbm [thread:$0]  %s2572_s21, 448, %s3709_s12, [#allocation5], %s3057_s23, %s3057_s23, %s3058_s24   ;;  %v1524_v10 = vadd.f32 %v2648_v14, %v3526_v20 }
 0xe02   :  { %s3059_s10 = smov [#allocation2]  }
 0xe03   :  { %3004 = vtanh.f32 %v1524_v10  ;;  %s2559_s12 = sshll.u32 %s3059_s10, 4  ;;  %s2560_s12 = int_to_ptr.vmem [resolvable:$true] %s2559_s12 }
 0xe04   :  { %s3028_s28 = scalar_lea.vmem %s2560_s12, 224  ;;  %p3033_p6 = scmp.lt.s32.totalorder %s2560_s12, %s2560_s12 }
 0xe05   :  { %p3029_p5 = scmp.ne.s32.totalorder %s2560_s12, %s3028_s28  ;;  %p3034_p7 = scmp.lt.s32.totalorder %s3028_s28, %s3028_s28 }
 0xe07   :  { %p3035_p8 = por %p3034_p7, %p3033_p6 }
 0xe09   :  { %p3036_p9 = pnand %p3035_p8, %p3029_p5 }
 0xe10   :  { %v3005_v18 = vpop.eup %3004 }
 0xe11   :  { %v2095_v19 = vcombine.high %v3005_v18, %v3005_v18  ;;  %v2102_v21 = vrot.slane %v3005_v18, %v3529_v28 }
 0xe13   :  { %v2109_v55 = vrot.slane %v2095_v19, %v3529_v28  ;;  %v2110_v24 = vcombine.high %v2102_v21, %v2102_v21  ;;  %v2118_v56 = vrot.slane %v2102_v21, %v3529_v28 }
 0xe15   :  { %v2111_v1 = vcombine.high %v2109_v55, %v2109_v55  ;;  %v2125_v8 = vrot.slane %v2109_v55, %v3529_v28  ;;  %v2132_v11 = vrot.slane %v2110_v24, %v3529_v28  ;;  %v2140_v29 = vcombine.high %v2118_v56, %v2118_v56 }
 0xe17   :  { %v2139_v34 = vrot.slane %v2111_v1, %v3529_v28  ;;  %v2141_v35 = vcombine.high %v2125_v8, %v2125_v8  ;;  %v2142_v26 = vcombine.high %v2132_v11, %v2132_v11 }
 0xebd   :  { %v2087_v16 = vpop.f32.mrf.mxu1 }
 0xebe   :  { %v2091_v46 = vadd.f32 %v2087_v16, %v1852_v15 }
 0xebf   :  { %v2957_v54 = vpop.f32.mrf.mxu1 }
 0xec0   :  { %v2092_v17 = vadd.f32 %v2648_v14, %v2091_v46 }
 0xec2   :  { %3006 = vtanh.f32 %v2092_v17 }
 0xecf   :  { %v3007_v22 = vpop.eup %3006 }
 0xed0   :  { %v2151_v20 = vcombine.high %v3007_v22, %v3007_v22  ;;  %v2158_v27 = vrot.slane %v3007_v22, %v3529_v28 }
 0xed2   :  { %v2165_v0 = vrot.slane %v2151_v20, %v3529_v28  ;;  %v2166_v23 = vcombine.high %v2158_v27, %v2158_v27  ;;  %v2174_v25 = vrot.slane %v2158_v27, %v3529_v28 }
 0xed4   :  { %v2167_v30 = vcombine.high %v2165_v0, %v2165_v0  ;;  %v2181_v31 = vrot.slane %v2165_v0, %v3529_v28  ;;  %v2188_v13 = vrot.slane %v2166_v23, %v3529_v28  ;;  %v2196_v33 = vcombine.high %v2174_v25, %v2174_v25 }
 0xed5   :  { %v2202_v36 = vrot.slane %v2174_v25, %v3383_v57 }
 0xed6   :  { %v2195_v37 = vrot.slane %v2167_v30, %v3529_v28  ;;  %v2197_v32 = vcombine.high %v2181_v31, %v2181_v31  ;;  %v2198_v38 = vcombine.high %v2188_v13, %v2188_v13  ;;  %v2206_v61 = vrot.slane %v2188_v13, %v3383_v57 }
 0xed7   :  { %v2210_v39 = vrot.slane %v2196_v33, %v3383_v57  ;;  %v2218_v40 = vrot.slane %v2181_v31, %v3383_v57  ;;  %v2234_v41 = vsel %vm1541_vm8, %v2118_v56, %v2202_v36 }
 0xed8   :  { %v2214_v42 = vrot.slane %v2198_v38, %v3383_v57  ;;  %v2222_v43 = vrot.slane %v2195_v37, %v3383_v57  ;;  %v2226_v44 = vrot.slane %v2197_v32, %v3383_v57  ;;  %v2235_v28 = vsel %vm1541_vm8, %v2132_v11, %v2206_v61  ;;  %2242 = vst.msk [vmem:[#allocation2] sm:$0x3] %vm2241_vm15, %v2234_v41 }
 0xed9   :  { %v2236_v51 = vsel %vm1541_vm8, %v2140_v29, %v2210_v39  ;;  %v2238_v45 = vsel %vm1541_vm8, %v2125_v8, %v2218_v40  ;;  %2243 = vst.msk [vmem:[#allocation2 + $0x2] sm:$0x3] %vm2241_vm15, %v2235_v28 }
 0xeda   :  { %v2237_v47 = vsel %vm1541_vm8, %v2142_v26, %v2214_v42  ;;  %v2239_v50 = vsel %vm1541_vm8, %v2139_v34, %v2222_v43  ;;  %v2240_v6 = vsel %vm1541_vm8, %v2141_v35, %v2226_v44  ;;  %2244 = vst.msk [vmem:[#allocation2 + $0x4] sm:$0x3] %vm2241_vm15, %v2236_v51  ;;  %2246 = vst.msk [vmem:[#allocation2 + $0x8] sm:$0x3] %vm2241_vm15, %v2238_v45 }
 0xedb   :  { %2245 = vst.msk [vmem:[#allocation2 + $0x6] sm:$0x3] %vm2241_vm15, %v2237_v47  ;;  %2247 = vst.msk [vmem:[#allocation2 + $0xa] sm:$0x3] %vm2241_vm15, %v2239_v50 }
 0xedc   :  { %2248 = vst.msk [vmem:[#allocation2 + $0xc] sm:$0x3] %vm2241_vm15, %v2240_v6 }
 0xedd   :  { %3039 = shalt.err (!%p3036_p9)
}
 0xede   :  { %2565 = dma.vmem_to_hbm [thread:$0]  %s2560_s12, 224, %s3708_s11, [#allocation3], %s3057_s23, %s3057_s23, %s3058_s24  }
 0xedf   :  { %3048 = dma.done.wait [#allocation3], 224  }
 0xee0   :  { %3049 = vsyncadd [#allocation3], 4294967072 }
 0xee1   :  { %3050 = dma.done.wait [#allocation5], 448  }
 0xee2   :  { %3051 = vsyncadd [#allocation5], 4294966848 }
 0xee3   :  { %2584 = vsyncpa [#allocation3], 1 }
 0xee4   :  { %2585 = vsyncpa [#allocation5], 1 }

</bundles_post_ra>
